<compile_context>
chip_gen: v5e
topology: v5e:2x2
jax: 0.10.0
libtpu: 0.0.40
codegen_flags: <defaults>
</compile_context>

<pallas_src>
import functools
import math

import jax
import jax.numpy as jnp
from jax.experimental import pallas as pl
from jax.experimental.pallas import tpu as pltpu


def _round_up(x, m):
    return (x + m - 1) // m * m


def _pad2d(x, rows, cols):
    r, c = x.shape
    if r == rows and c == cols:
        return x
    return jnp.pad(x, ((0, rows - r), (0, cols - c)))


# ---------------------------------------------------------------------------
# GraphConv layer: mean-aggregate over in-neighbors, then ReLU(W h + b)
# ---------------------------------------------------------------------------
def _gcn_layer_kernel(a_ref, xk_ref, xi_ref, w_ref, b_ref, o_ref,
                      acc_ref, deg_ref):
    k = pl.program_id(1)

    @pl.when(k == 0)
    def _():
        acc_ref[...] = jnp.zeros_like(acc_ref)
        deg_ref[...] = jnp.zeros_like(deg_ref)

    a = a_ref[...].astype(jnp.float32)            # bf16 0/1 tile -> exact f32
    acc_ref[...] += jnp.dot(a, xk_ref[...], preferred_element_type=jnp.float32)
    # XLU row-sum overlaps the MXU stream; accumulates in-degree per K tile.
    deg_ref[...] += jnp.sum(a, axis=1, keepdims=True)

    @pl.when(k == pl.num_programs(1) - 1)
    def _():
        deg = deg_ref[...]
        mean_agg = acc_ref[...] / jnp.maximum(deg, 1.0)
        h = jnp.where(deg > 0.0, mean_agg, xi_ref[...])   # zero in-degree: keep x
        y = jnp.dot(h, w_ref[...], preferred_element_type=jnp.float32) + b_ref[...]
        o_ref[...] = jnp.maximum(y, 0.0).astype(o_ref.dtype)


def _gcn_layer(adj_pad_bf16, x, w, b, *, n, tm, tk):
    """adj_pad_bf16: [n_pad, n_pad] bf16; x: [n, fin]; w: [fin, fout]; b: [fout]."""
    n_pad = adj_pad_bf16.shape[0]
    fin, fout = w.shape
    fin_p = _round_up(fin, 128)
    fout_p = _round_up(fout, 128)

    x_p = _pad2d(x.astype(jnp.float32), n_pad, fin_p)
    w_p = _pad2d(w.astype(jnp.float32), fin_p, fout_p)
    b_p = _pad2d(b.reshape(1, fout).astype(jnp.float32), 1, fout_p)

    grid = (n_pad // tm, n_pad // tk)
    flops = 2 * n_pad * n_pad * fin_p + 2 * n_pad * fin_p * fout_p
    bytes_accessed = (adj_pad_bf16.size * 2 + 2 * x_p.size * 4
                      + w_p.size * 4 + n_pad * fout_p * 4)

    out = pl.pallas_call(
        _gcn_layer_kernel,
        out_shape=jax.ShapeDtypeStruct((n_pad, fout_p), jnp.float32),
        grid_spec=pltpu.PrefetchScalarGridSpec(
            num_scalar_prefetch=0,
            grid=grid,
            in_specs=[
                pl.BlockSpec((tm, tk), lambda i, k: (i, k)),         # A tile
                pl.BlockSpec((tk, fin_p), lambda i, k: (k, 0)),      # X (contraction rows)
                pl.BlockSpec((tm, fin_p), lambda i, k: (i, 0)),      # X (zero-deg fallback)
                pl.BlockSpec((fin_p, fout_p), lambda i, k: (0, 0)),  # W (resident)
                pl.BlockSpec((1, fout_p), lambda i, k: (0, 0)),      # bias (resident)
            ],
            out_specs=pl.BlockSpec((tm, fout_p), lambda i, k: (i, 0)),
            scratch_shapes=[
                pltpu.VMEM((tm, fin_p), jnp.float32),  # aggregation accumulator
                pltpu.VMEM((tm, 1), jnp.float32),      # in-degree accumulator
            ],
        ),
        compiler_params=pltpu.CompilerParams(
            dimension_semantics=("parallel", "arbitrary"),
            vmem_limit_bytes=48 * 1024 * 1024,
        ),
        cost_estimate=pl.CostEstimate(
            flops=flops, transcendentals=0, bytes_accessed=bytes_accessed),
    )(adj_pad_bf16, x_p, x_p, w_p, b_p)
    return out[:n, :fout]


# ---------------------------------------------------------------------------
# Readout (mean over nodes) + 3-layer MLP head, fused into one kernel
# ---------------------------------------------------------------------------
def _readout_mlp_kernel(h_ref, w1_ref, b1_ref, w2_ref, b2_ref, w3_ref, b3_ref,
                        o_ref, sum_ref, *, inv_n):
    i = pl.program_id(0)

    @pl.when(i == 0)
    def _():
        sum_ref[...] = jnp.zeros_like(sum_ref)

    sum_ref[...] += jnp.sum(h_ref[...], axis=0, keepdims=True)

    @pl.when(i == pl.num_programs(0) - 1)
    def _():
        hid_p = sum_ref.shape[1]
        hg = jnp.broadcast_to(sum_ref[...] * inv_n, (8, hid_p))  # sublane-aligned
        y = jnp.maximum(
            jnp.dot(hg, w1_ref[...], preferred_element_type=jnp.float32) + b1_ref[...], 0.0)
        y = jnp.maximum(
            jnp.dot(y, w2_ref[...], preferred_element_type=jnp.float32) + b2_ref[...], 0.0)
        y = jnp.dot(y, w3_ref[...], preferred_element_type=jnp.float32) + b3_ref[...]
        o_ref[...] = y[0:1, :].astype(o_ref.dtype)


def _readout_mlp(h, w1, b1, w2, b2, w3, b3, *, tm):
    n, hid = h.shape
    ncls = w3.shape[1]
    n_pad = _round_up(n, tm)
    hid_p = _round_up(hid, 128)
    ncls_p = _round_up(ncls, 128)

    h_p = _pad2d(h.astype(jnp.float32), n_pad, hid_p)
    w1_p = _pad2d(w1.astype(jnp.float32), hid_p, hid_p)
    b1_p = _pad2d(b1.reshape(1, -1).astype(jnp.float32), 1, hid_p)
    w2_p = _pad2d(w2.astype(jnp.float32), hid_p, hid_p)
    b2_p = _pad2d(b2.reshape(1, -1).astype(jnp.float32), 1, hid_p)
    w3_p = _pad2d(w3.astype(jnp.float32), hid_p, ncls_p)
    b3_p = _pad2d(b3.reshape(1, -1).astype(jnp.float32), 1, ncls_p)

    kern = functools.partial(_readout_mlp_kernel, inv_n=1.0 / n)
    out = pl.pallas_call(
        kern,
        out_shape=jax.ShapeDtypeStruct((1, ncls_p), jnp.float32),
        grid_spec=pltpu.PrefetchScalarGridSpec(
            num_scalar_prefetch=0,
            grid=(n_pad // tm,),
            in_specs=[
                pl.BlockSpec((tm, hid_p), lambda i: (i, 0)),
                pl.BlockSpec((hid_p, hid_p), lambda i: (0, 0)),
                pl.BlockSpec((1, hid_p), lambda i: (0, 0)),
                pl.BlockSpec((hid_p, hid_p), lambda i: (0, 0)),
                pl.BlockSpec((1, hid_p), lambda i: (0, 0)),
                pl.BlockSpec((hid_p, ncls_p), lambda i: (0, 0)),
                pl.BlockSpec((1, ncls_p), lambda i: (0, 0)),
            ],
            out_specs=pl.BlockSpec((1, ncls_p), lambda i: (0, 0)),
            scratch_shapes=[pltpu.VMEM((1, hid_p), jnp.float32)],
        ),
        compiler_params=pltpu.CompilerParams(
            dimension_semantics=("arbitrary",),
            vmem_limit_bytes=48 * 1024 * 1024,
        ),
    )(h_p, w1_p, b1_p, w2_p, b2_p, w3_p, b3_p)
    return out[:, :ncls]


# ---------------------------------------------------------------------------
# Full GCNReg_print forward (saliency=False)
# ---------------------------------------------------------------------------
def gcnreg_forward(adj, feature, params, *, tm=256, tk=512, rm=256):
    """adj: [N, N] f32 (0/1), feature: [N, in_dim], params: 5 (W, b) pairs."""
    (w1, b1), (w2, b2), (wc1, bc1), (wc2, bc2), (wc3, bc3) = params
    n = feature.shape[0]
    n_pad = _round_up(n, math.lcm(tm, tk))

    # 0/1 adjacency is exact in bf16: halves HBM/VMEM traffic of the dominant operand.
    adj_p = _pad2d(adj, n_pad, n_pad).astype(jnp.bfloat16)

    h1 = _gcn_layer(adj_p, feature.astype(jnp.float32), w1, b1, n=n, tm=tm, tk=tk)
    h2 = _gcn_layer(adj_p, h1, w2, b2, n=n, tm=tm, tk=tk)
    return _readout_mlp(h2, wc1, bc1, wc2, bc2, wc3, bc3, tm=rm)


# ---------------------------------------------------------------------------
# Pure-JAX reference
# ---------------------------------------------------------------------------
def reference_forward(adj, feature, params):
    (w1, b1), (w2, b2), (wc1, bc1), (wc2, bc2), (wc3, bc3) = params

    def gcn_ref(h, w, b):
        deg = jnp.sum(adj, axis=1, keepdims=True)
        agg = adj @ h
        m = jnp.where(deg > 0.0, agg / jnp.maximum(deg, 1.0), h)
        return jnp.maximum(m @ w + b[None, :], 0.0)

    h1 = gcn_ref(feature, w1, b1)
    h2 = gcn_ref(h1, w2, b2)
    hg = jnp.mean(h2, axis=0, keepdims=True)
    o = jnp.maximum(hg @ wc1 + bc1[None, :], 0.0)
    o = jnp.maximum(o @ wc2 + bc2[None, :], 0.0)
    return o @ wc3 + bc3[None, :]


if __name__ == "__main__":
    key = jax.random.PRNGKey(0)
    keys = jax.random.split(key, 12)

    N, IN_DIM, HIDDEN, N_CLASSES = 200, 16, 32, 1

    # Deterministic synthetic directed graph: sparse random edges, no self-loops,
    # node 0 has zero in-degree to exercise the "keep original feature" path.
    adj = (jax.random.uniform(keys[0], (N, N)) < 0.05).astype(jnp.float32)
    adj = adj * (1.0 - jnp.eye(N, dtype=jnp.float32))
    adj = adj.at[0, :].set(0.0)

    feature = jax.random.normal(keys[1], (N, IN_DIM), dtype=jnp.float32)

    def linear_init(kw, kb, fan_in, fan_out):
        bound = 1.0 / (fan_in ** 0.5)
        w = jax.random.uniform(kw, (fan_in, fan_out), jnp.float32, -bound, bound)
        b = jax.random.uniform(kb, (fan_out,), jnp.float32, -bound, bound)
        return w, b

    params = (
        linear_init(keys[2], keys[3], IN_DIM, HIDDEN),       # conv1
        linear_init(keys[4], keys[5], HIDDEN, HIDDEN),        # conv2
        linear_init(keys[6], keys[7], HIDDEN, HIDDEN),        # classify1
        linear_init(keys[8], keys[9], HIDDEN, HIDDEN),        # classify2
        linear_init(keys[10], keys[11], HIDDEN, N_CLASSES),   # classify3
    )

    # Small tiles at test size so the K-accumulation / finalize and the padding
    # paths are exercised (N=200 -> padded 256, conv grid = (2, 2)).
    out = gcnreg_forward(adj, feature, params, tm=128, tk=128, rm=128)
    out = jax.block_until_ready(out)

    ref = reference_forward(adj, feature, params)
    assert out.shape == (1, N_CLASSES)
    assert jnp.allclose(out, ref, atol=1e-4, rtol=1e-4), (out, ref)

    print("KERNEL_OK")
</pallas_src>

<mosaic_0001>
module attributes {stable_mosaic.version = 11 : i64} {
  func.func @_gcn_layer_kernel(%arg0: i32, %arg1: i32, %arg2: memref<128x128xbf16, #tpu.memory_space<vmem>>, %arg3: memref<128x128xf32, #tpu.memory_space<vmem>>, %arg4: memref<128x128xf32, #tpu.memory_space<vmem>>, %arg5: memref<128x128xf32, #tpu.memory_space<vmem>>, %arg6: memref<1x128xf32, #tpu.memory_space<vmem>>, %arg7: memref<128x128xf32, #tpu.memory_space<vmem>>, %arg8: memref<128x128xf32, #tpu.memory_space<vmem>>, %arg9: memref<128x1xf32, #tpu.memory_space<vmem>>) attributes {dimension_semantics = [#tpu.dimension_semantics<parallel>, #tpu.dimension_semantics<arbitrary>], iteration_bounds = array<i64: 2, 2>, scalar_prefetch = 0 : i64, scratch_operands = 2 : i64, tpu.core_type = #tpu.core_type<tc>, window_params = [{transform_indices = @transform_0, window_bounds = array<i64: 128, 128>}, {transform_indices = @transform_1, window_bounds = array<i64: 128, 128>}, {transform_indices = @transform_2, window_bounds = array<i64: 128, 128>}, {pipeline_mode = #tpu.pipeline_mode<synchronous>, transform_indices = @transform_3, window_bounds = array<i64: 128, 128>}, {pipeline_mode = #tpu.pipeline_mode<synchronous>, transform_indices = @transform_4, window_bounds = array<i64: 1, 128>}, {transform_indices = @transform_5, window_bounds = array<i64: 128, 128>}]} {
    %c0_i32 = arith.constant 0 : i32
    %0 = arith.cmpi eq, %arg1, %c0_i32 : i32
    %1 = arith.extui %0 : i1 to i32
    %c0_i32_0 = arith.constant 0 : i32
    %2 = arith.cmpi ne, %1, %c0_i32_0 : i32
    scf.if %2 {
      %cst_14 = arith.constant 0.000000e+00 : f32
      %18 = vector.broadcast %cst_14 : f32 to vector<128x128xf32>
      %c0_15 = arith.constant 0 : index
      %c0_16 = arith.constant 0 : index
      %19 = vector.load %arg8[%c0_15, %c0_16] : memref<128x128xf32, #tpu.memory_space<vmem>>, vector<128x128xf32>
      tpu.vector_store %arg8[%c0_15, %c0_16], %18 {strides = array<i32>} : memref<128x128xf32, #tpu.memory_space<vmem>>, vector<128x128xf32>,
      %cst_17 = arith.constant 0.000000e+00 : f32
      %20 = vector.broadcast %cst_17 : f32 to vector<128x1xf32>
      %c0_18 = arith.constant 0 : index
      %c0_19 = arith.constant 0 : index
      %21 = vector.load %arg9[%c0_18, %c0_19] : memref<128x1xf32, #tpu.memory_space<vmem>>, vector<128x1xf32>
      tpu.vector_store %arg9[%c0_18, %c0_19], %20 {strides = array<i32>} : memref<128x1xf32, #tpu.memory_space<vmem>>, vector<128x1xf32>,
    } else {
    }
    %c0 = arith.constant 0 : index
    %c0_1 = arith.constant 0 : index
    %3 = vector.load %arg2[%c0, %c0_1] : memref<128x128xbf16, #tpu.memory_space<vmem>>, vector<128x128xbf16>
    %4 = arith.extf %3 : vector<128x128xbf16> to vector<128x128xf32>
    %c0_2 = arith.constant 0 : index
    %c0_3 = arith.constant 0 : index
    %5 = vector.load %arg8[%c0_2, %c0_3] : memref<128x128xf32, #tpu.memory_space<vmem>>, vector<128x128xf32>
    %c0_4 = arith.constant 0 : index
    %c0_5 = arith.constant 0 : index
    %6 = vector.load %arg3[%c0_4, %c0_5] : memref<128x128xf32, #tpu.memory_space<vmem>>, vector<128x128xf32>
    %cst = arith.constant dense<0.000000e+00> : vector<128x128xf32>
    %7 = tpu.matmul %4, %6, %cst {dimension_numbers = #tpu.dot_dimension_numbers<[1], [0], [0], [1], [0, 0, 1, 1], [], []>} : vector<128x128xf32>, vector<128x128xf32>, vector<128x128xf32> -> vector<128x128xf32>
    %8 = arith.addf %5, %7 : vector<128x128xf32>
    %c0_6 = arith.constant 0 : index
    %c0_7 = arith.constant 0 : index
    %9 = vector.load %arg8[%c0_6, %c0_7] : memref<128x128xf32, #tpu.memory_space<vmem>>, vector<128x128xf32>
    tpu.vector_store %arg8[%c0_6, %c0_7], %8 {strides = array<i32>} : memref<128x128xf32, #tpu.memory_space<vmem>>, vector<128x128xf32>,
    %c0_8 = arith.constant 0 : index
    %c0_9 = arith.constant 0 : index
    %10 = vector.load %arg9[%c0_8, %c0_9] : memref<128x1xf32, #tpu.memory_space<vmem>>, vector<128x1xf32>
    %cst_10 = arith.constant dense<0.000000e+00> : vector<128xf32>
    %11 = vector.multi_reduction <add>, %4, %cst_10 [1] : vector<128x128xf32> to vector<128xf32>
    %12 = vector.shape_cast %11 : vector<128xf32> to vector<128x1xf32>
    %13 = arith.addf %10, %12 : vector<128x1xf32>
    %c0_11 = arith.constant 0 : index
    %c0_12 = arith.constant 0 : index
    %14 = vector.load %arg9[%c0_11, %c0_12] : memref<128x1xf32, #tpu.memory_space<vmem>>, vector<128x1xf32>
    tpu.vector_store %arg9[%c0_11, %c0_12], %13 {strides = array<i32>} : memref<128x1xf32, #tpu.memory_space<vmem>>, vector<128x1xf32>,
    %c1_i32 = arith.constant 1 : i32
    %15 = arith.cmpi eq, %arg1, %c1_i32 : i32
    %16 = arith.extui %15 : i1 to i32
    %c0_i32_13 = arith.constant 0 : i32
    %17 = arith.cmpi ne, %16, %c0_i32_13 : i32
    scf.if %17 {
      %c0_14 = arith.constant 0 : index
      %c0_15 = arith.constant 0 : index
      %18 = vector.load %arg9[%c0_14, %c0_15] : memref<128x1xf32, #tpu.memory_space<vmem>>, vector<128x1xf32>
      %c0_16 = arith.constant 0 : index
      %c0_17 = arith.constant 0 : index
      %19 = vector.load %arg8[%c0_16, %c0_17] : memref<128x128xf32, #tpu.memory_space<vmem>>, vector<128x128xf32>
      %cst_18 = arith.constant 1.000000e+00 : f32
      %20 = vector.broadcast %cst_18 : f32 to vector<128x1xf32>
      %21 = arith.maximumf %18, %20 : vector<128x1xf32>
      %22 = vector.broadcast %21 : vector<128x1xf32> to vector<128x128xf32>
      %23 = arith.divf %19, %22 : vector<128x128xf32>
      %cst_19 = arith.constant 0.000000e+00 : f32
      %24 = vector.broadcast %cst_19 : f32 to vector<128x1xf32>
      %25 = arith.cmpf ogt, %18, %24 : vector<128x1xf32>
      %c0_20 = arith.constant 0 : index
      %c0_21 = arith.constant 0 : index
      %26 = vector.load %arg4[%c0_20, %c0_21] : memref<128x128xf32, #tpu.memory_space<vmem>>, vector<128x128xf32>
      %27 = vector.shape_cast %25 : vector<128x1xi1> to vector<128x1xi1>
      %28 = vector.broadcast %27 : vector<128x1xi1> to vector<128x128xi1>
      %29 = arith.select %28, %23, %26 : vector<128x128xi1>, vector<128x128xf32>
      %c0_22 = arith.constant 0 : index
      %c0_23 = arith.constant 0 : index
      %30 = vector.load %arg5[%c0_22, %c0_23] : memref<128x128xf32, #tpu.memory_space<vmem>>, vector<128x128xf32>
      %cst_24 = arith.constant dense<0.000000e+00> : vector<128x128xf32>
      %31 = tpu.matmul %29, %30, %cst_24 {dimension_numbers = #tpu.dot_dimension_numbers<[1], [0], [0], [1], [0, 0, 1, 1], [], []>} : vector<128x128xf32>, vector<128x128xf32>, vector<128x128xf32> -> vector<128x128xf32>
      %c0_25 = arith.constant 0 : index
      %c0_26 = arith.constant 0 : index
      %32 = vector.load %arg6[%c0_25, %c0_26] : memref<1x128xf32, #tpu.memory_space<vmem>>, vector<1x128xf32>
      %33 = vector.broadcast %32 : vector<1x128xf32> to vector<128x128xf32>
      %34 = arith.addf %31, %33 : vector<128x128xf32>
      %cst_27 = arith.constant 0.000000e+00 : f32
      %35 = vector.broadcast %cst_27 : f32 to vector<128x128xf32>
      %36 = arith.maximumf %34, %35 : vector<128x128xf32>
      %c0_28 = arith.constant 0 : index
      %c0_29 = arith.constant 0 : index
      %37 = vector.load %arg7[%c0_28, %c0_29] : memref<128x128xf32, #tpu.memory_space<vmem>>, vector<128x128xf32>
      tpu.vector_store %arg7[%c0_28, %c0_29], %36 {strides = array<i32>} : memref<128x128xf32, #tpu.memory_space<vmem>>, vector<128x128xf32>,
    } else {
    }
    return
  }
  func.func @transform_0(%arg0: i32, %arg1: i32) -> (i32, i32) {
    %c0_i32 = arith.constant 0 : i32
    return %arg0, %arg1 : i32, i32
  }
  func.func @transform_1(%arg0: i32, %arg1: i32) -> (i32, i32) {
    %c0_i32 = arith.constant 0 : i32
    %c0_i32_0 = arith.constant 0 : i32
    return %arg1, %c0_i32 : i32, i32
  }
  func.func @transform_2(%arg0: i32, %arg1: i32) -> (i32, i32) {
    %c0_i32 = arith.constant 0 : i32
    %c0_i32_0 = arith.constant 0 : i32
    return %arg0, %c0_i32 : i32, i32
  }
  func.func @transform_3(%arg0: i32, %arg1: i32) -> (i32, i32) {
    %c0_i32 = arith.constant 0 : i32
    %c0_i32_0 = arith.constant 0 : i32
    %c0_i32_1 = arith.constant 0 : i32
    return %c0_i32, %c0_i32_0 : i32, i32
  }
  func.func @transform_4(%arg0: i32, %arg1: i32) -> (i32, i32) {
    %c0_i32 = arith.constant 0 : i32
    %c0_i32_0 = arith.constant 0 : i32
    %c0_i32_1 = arith.constant 0 : i32
    return %c0_i32, %c0_i32_0 : i32, i32
  }
  func.func @transform_5(%arg0: i32, %arg1: i32) -> (i32, i32) {
    %c0_i32 = arith.constant 0 : i32
    %c0_i32_0 = arith.constant 0 : i32
    return %arg0, %c0_i32 : i32, i32
  }
}

</mosaic_0001>

<bundles_post_ra>
// kernel: tpu_custom_call.1
= control target key start
LH: loop header
LB: loop body
LE: loop exit
PB: predicated region body
PF: predicated region fallthrough
CT: control target
= control target key end

     0   :  { %s2919_s0 = inlined_call_operand.hbm [shape: bf16[256,256], index: 0, kind: input, shape index: {}]   ;;  %s2920_s1 = inlined_call_operand.hbm [shape: f32[256,128], index: 1, kind: input, shape index: {}]   ;;  %s2921_s2 = inlined_call_operand.hbm [shape: f32[256,128], index: 2, kind: input, shape index: {}]   ;;  %s2922_s3 = inlined_call_operand.hbm [shape: f32[128,128], index: 3, kind: input, shape index: {}]   ;;  %s2923_s4 = inlined_call_operand.vmem [shape: f32[1,128], index: 4, kind: input, shape index: {}]   ;;  %s2924_s5 = inlined_call_operand.hbm [shape: f32[256,128], index: 5, kind: output, shape index: {}]  }
   0x1   :  { %2933 = sst [smem:[#allocation25_spill]] %s2919_s0 }
   0x2   :  { %2934 = sst [smem:[#allocation26_spill]] %s2920_s1 }
   0x3   :  { %2935 = sst [smem:[#allocation27_spill]] %s2922_s3 }
   0x4   :  { %2936 = sst [smem:[#allocation28_spill]] %s2923_s4 }
   0x5   :  { %2937 = sst [smem:[#allocation29_spill]] %s2924_s5 }
   0x6   :  { %10 = vsyncpa [#allocation5], 0 }
   0x7   :  { %12 = vsyncpa [#allocation5 + $0x1], 0 }
   0x8   :  { %13 = vsyncpa [#allocation8], 0 }
   0x9   :  { %15 = vsyncpa [#allocation8 + $0x1], 0 }
   0xa   :  { %16 = vsyncpa [#allocation11], 0 }
   0xb   :  { %17 = vsyncpa [#allocation6], 0 }
   0xc   :  { %19 = vsyncpa [#allocation6 + $0x1], 0  ;;  %s2091_s18 = smov 0   ;;  %s2093_s19 = smov 0  }
   0xd   :  { %s2095_s20 = smov 0   ;;  %s2097_s21 = smov 0  }
   0xe   :  { %s2099_s22 = smov 0   ;;  %s2101_s23 = smov 0  }
   0xf   :  { %s2103_s24 = smov 0   ;;  %s2105_s25 = smov 0  }
  0x10   :  { %s2107_s26 = smov 0   ;;  %s2109_s27 = smov 0  }
  0x11   :  { %s2111_s28 = smov 0   ;;  %s2113_s29 = smov 0  }
  0x12   :  { %s2115_s30 = smov 0   ;;  %s2117_s6 = smov 0  }
  0x13 LB: > { %2938 = sst [smem:[#allocation18_spill]] %s2018_s23  ;;  %s34_s7 = sadd.s32 1, %s2042_s29  ;;  %s2050_s6 = sphi %s2117_s6, %s25_s6   ;;  %s2046_s30 = sphi %s2115_s30, %s3013_s30   ;;  %s2042_s29 = sphi %s2113_s29, %s3012_s29   ;;  %s2038_s28 = sphi %s2111_s28, %s3011_s28   ;;  %s2034_s27 = sphi %s2109_s27, %s3000_s27   ;;  %s2030_s26 = sphi %s2107_s26, %s3010_s26   ;;  %s2026_s25 = sphi %s2105_s25, %s3009_s25   ;;  %s2022_s24 = sphi %s2103_s24, %s3008_s24   ;;  %s2018_s23 = sphi %s2101_s23, %s2998_s23   ;;  %s2014_s22 = sphi %s2099_s22, %s3007_s22   ;;  %s2010_s21 = sphi %s2097_s21, %s3006_s21   ;;  %s2006_s20 = sphi %s2095_s20, %s3005_s20   ;;  %s2002_s19 = sphi %s2093_s19, %s3004_s19   ;;  %s1998_s18 = sphi %s2091_s18, %s3003_s18  }
  0x14   : > { %2939 = sst [smem:[#allocation19_spill]] %s2038_s28  ;;  %s37_s8 = sadd.s32 1, %s2046_s30 }
  0x15   : > { %2940 = sst [smem:[#allocation20_spill]] %s2042_s29  ;;  %p35_p0 = scmp.ge.s32.totalorder %s34_s7, 2 }
  0x16   : > { %p54_p1 = scmp.eq.s32.totalorder %s2050_s6, 0  ;;  %s72_s9 = sadd.s32 1, %s2018_s23 }
  0x17   : > { %p79_p2 = scmp.ne.s32.totalorder %s2018_s23, %s2014_s22  ;;  %s3015_s7 = smov (%p35_p0, %s34_s7), 0 }
  0x18   : > { %2941 = sst [smem:[#allocation21_spill]] %s3015_s7  ;;  %s3017_s8 = smov (!%p35_p0, %s37_s8), %s2046_s30 }
  0x19   : > { %s42_s10 = ssub.s32 %s2042_s29, %s3015_s7  ;;  %p2174_p3 = por %p79_p2, %p54_p1 }
  0x1a   : > { %p39_p4 = scmp.ge.s32.totalorder %s3017_s8, 2  ;;  %p70_p5 = scmp.eq.s32.totalorder %s42_s10, 0 }
  0x1b   : > { %p85_p6 = scmp.ne.s32.totalorder %s2014_s22, %s2010_s21  ;;  %p1612_p9 = scmp.lt.s32.totalorder %s2050_s6, 4 }
  0x1c   : > { %s3019_s8 = smov (%p39_p4, %s3017_s8), 0  ;;  %s244_s16 = sand.u32 1, %s2050_s6  }
  0x1d   : > { %2943 = sst [smem:[#allocation22_spill]] %s3019_s8  ;;  %s2187_s13 = ssub.s32 %s2046_s30, %s3019_s8 }
  0x1e   : > { %s2183_s12 = scalar_select %p70_p5, %s2018_s23, %s72_s9  }
  0x1f   : > { %s43_s14 = sor.u32 %s42_s10, %s2187_s13  ;;  %p96_p7 = scmp.eq.s32.totalorder %s2187_s13, 0 }
  0x20   : > { %2944 = sst [smem:[#allocation23_spill]] %s2183_s12  ;;  %p2191_p8 = scmp.eq.s32.totalorder %s43_s14, 0 }
  0x21   : > { %s246_s17 = sand.u32 1, %s2018_s23   ;;  %s1443_s9 = sshll.u32 %s2042_s29, 7 }
  0x22   : > { %s1423_s7 = sshll.u32 %s246_s17, 7  ;;  %s2946_s1 = sld [smem:[#allocation26_spill]] }
  0x23   : > { %s248_s28 = scalar_lea.vmem [#allocation7], %s1423_s7  ;;  %p1601_p10 = pnand %p1612_p9, %p2174_p3 }
  0x24   : > { %s256_s14 = sshll.u32 %s248_s28, 4  ;;  %s2206_s4 = scalar_lea.sflag [#allocation8], %s244_s16  ;;  %s257_s14 = int_to_ptr.vmem [resolvable:$true] %s256_s14 }
  0x25   : > { %s2930_s17 = smov 128   ;;  %s2929_s23 = smov 8  }
  0x26   : > { %s2213_s5 = sadd.s32 4294967295, %s2050_s6   ;;  %p1416_p11 = scmp.ge.s32.totalorder %s2050_s6, 1 }
  0x27   : > { %p60_p12 = scmp.eq.s32.totalorder %s2213_s5, 0  ;;  %p177_p13 = scmp.eq.s32.totalorder %s2213_s5, 3 }
  0x28   : > { %s253_s8 = scalar_lea.hbm %s2946_s1, %s1443_s9  ;;  %p190_p0 = scmp.lt.s32.totalorder %s2050_s6, 5 }
  0x29   : > { %s254_s10 = sshll.u32 %s253_s8, 4  ;;  %p2224_p2 = por %p85_p6, %p60_p12  ;;  %s255_s10 = int_to_ptr.hbm [resolvable:$true] %s254_s10 }
  0x2a   : > { %1603 = dma.hbm_to_vmem [thread:$0]  (!%p1601_p10), %s255_s10, 2048, %s257_s14, %s2206_s4, %s2930_s17, %s2930_s17, %s2929_s23  }
  0x2b   : > { %s2948_s3 = sld [smem:[#allocation27_spill]]  ;;  %p2231_p3 = pnand %p1416_p11, %p190_p0 }
  0x2c   : > { %s2054_s21 = smov [#allocation10]   ;;  %s46_s9 = sadd.s32 1, %s2030_s26 }
  0x2d   : > { %p1593_p4 = pneg %p2231_p3  ;;  %s203_s16 = sshll.u32 %s2054_s21, 4  ;;  %s204_s16 = int_to_ptr.vmem [resolvable:$true] %s203_s16 }
  0x2e   : > { %p53_p6 = scmp.ne.s32.totalorder %s2030_s26, %s2026_s25  ;;  %p59_p11 = scmp.ne.s32.totalorder %s2026_s25, %s2022_s24 }
  0x2f   : > { %p1594_p5 = pnand %p1593_p4, %p60_p12  ;;  %s220_s7 = sand.u32 1, %s2030_s26  }
  0x30   : > { %s2248_s10 = scalar_select %p2191_p8, %s2030_s26, %s46_s9  }
  0x31   : > { %s201_s11 = sshll.u32 %s2948_s3, 4  ;;  %p2252_p10 = por %p54_p1, %p53_p6  ;;  %s202_s11 = int_to_ptr.hbm [resolvable:$true] %s201_s11 }
  0x32   : > { %1596 = dma.hbm_to_vmem [thread:$0]  (!%p1594_p5), %s202_s11, 2048, %s204_s16, [#allocation11], %s2930_s17, %s2930_s17, %s2929_s23  }
  0x33   : > { %2950 = sst [smem:[#allocation24_spill]] %s2248_s10  ;;  %s1442_s8 = sshll.u32 %s2046_s30, 5 }
  0x34   : > { %p2262_p0 = por %p60_p12, %p59_p11  ;;  %s1419_s15 = sshll.u32 %s220_s7, 6 }
  0x35   : > { %s229_s11 = sadd.s32 %s2042_s29, %s1442_s8  ;;  %s2953_s0 = sld [smem:[#allocation25_spill]] }
  0x36   : > { %s1422_s16 = sshll.u32 %s229_s11, 2  ;;  %s224_s17 = scalar_lea.vmem [#allocation4], %s1419_s15 }
  0x37   : > { %s234_s1 = sshll.u32 %s224_s17, 4  ;;  %p1598_p8 = pnand %p1612_p9, %p2252_p10  ;;  %s235_s1 = int_to_ptr.vmem [resolvable:$true] %s234_s1 }
  0x38   : > { %s221_s8 = scalar_lea.sflag [#allocation5], %s220_s7  ;;  %s2055_s11 = smov 64  }
  0x39   : > { %s2056_s29 = smov 4   ;;  %s2954_s23 = smov 128  }
  0x3a   : > { %s98_s9 = sadd.s32 1, %s2006_s20  ;;  %p105_p4 = scmp.ne.s32.totalorder %s2006_s20, %s2002_s19 }
  0x3b   : > { %s231_s24 = scalar_lea.hbm %s2953_s0, %s1422_s16  ;;  %s1415_s16 = sadd.s32 4294967294, %s2050_s6  }
  0x3c   : > { %s232_s3 = sshll.u32 %s231_s24, 4  ;;  %p2286_p5 = por %p105_p4, %p54_p1  ;;  %s233_s3 = int_to_ptr.hbm [resolvable:$true] %s232_s3 }
  0x3d   : > { %1600 = dma.hbm_to_vmem [thread:$0]  (!%p1598_p8), %s233_s3, 1024, %s235_s1, %s221_s8, %s2954_s23, %s2055_s11, %s2056_s29  }
  0x3e   : > { %s2282_s15 = scalar_select %p96_p7, %s2006_s20, %s98_s9  }
  0x3f   : > { %p111_p6 = scmp.ne.s32.totalorder %s2002_s19, %s1998_s18  ;;  %p2294_p10 = por %p177_p13, %p105_p4 }
  0x40   : > { %p183_p11 = scmp.eq.s32.totalorder %s1415_s16, 3  ;;  %s268_s3 = sand.u32 1, %s2006_s20  }
  0x41   : > { %p2300_p8 = por %p111_p6, %p60_p12  ;;  %s1426_s13 = sshll.u32 %s268_s3, 7 }
  0x42   : > { %p2305_p7 = por %p183_p11, %p111_p6  ;;  %s1444_s7 = sshll.u32 %s2046_s30, 7 }
  0x43   : > { %s275_s11 = scalar_lea.hbm %s2921_s2, %s1444_s7  ;;  %s270_s9 = scalar_lea.vmem [#allocation9], %s1426_s13 }
  0x44   : > { %s278_s0 = sshll.u32 %s270_s9, 4  ;;  %s276_s10 = sshll.u32 %s275_s11, 4  ;;  %s279_s0 = int_to_ptr.vmem [resolvable:$true] %s278_s0  ;;  %s277_s10 = int_to_ptr.hbm [resolvable:$true] %s276_s10 }
  0x45   : > { %p1604_p1 = pnand %p1612_p9, %p2286_p5  ;;  %s2959_s16 = smov 8  }
  0x46   : > { %290 = sbr.rel (%p2231_p3) target bundleno = 673 (0x2a1), region = 40  ;;  %s292_s3 = sand.u32 (!%p2231_p3), 1, %s2026_s25  }
  0x47   : > { %1606 = dma.hbm_to_vmem [thread:$0]  (!%p1604_p1), %s277_s10, 2048, %s279_s0, %s2206_s4, %s2954_s23, %s2954_s23, %s2959_s16  }
  0x48   : > { %s1430_s24 = sshll.u32 (!%p2231_p3), %s292_s3, 6  ;;  %s293_s7 = scalar_lea.sflag (!%p2231_p3), [#allocation5], %s292_s3 }
  0x49   : > { %s2324_s13 = scalar_lea.vmem (!%p2231_p3), [#allocation4], %s1430_s24 }
  0x4b   : > { %1977 = dma.done.wait (%p2262_p0), %s293_s7, 1024  }
  0x4c   : > { %1979 = vsyncadd (%p2262_p0), %s293_s7, 4294966272  ;;  %s302_s17 = sand.u32 1, %s2213_s5   ;;  %s304_s0 = sand.u32 1, %s2014_s22  }
  0x4d   : > { %s1431_s4 = sshll.u32 %s304_s0, 7  ;;  %s303_s12 = scalar_lea.sflag [#allocation8], %s302_s17 }
  0x4e   : > { %s2332_s10 = scalar_lea.vmem [#allocation7], %s1431_s4 }
  0x4f   : > { %1981 = dma.done.wait (%p2224_p2), %s303_s12, 2048  }
  0x50   : > { %1983 = vsyncadd (%p2224_p2), %s303_s12, 4294965248  ;;  %s314_s23 = sand.u32 1, %s2002_s19  }
  0x51   : > { %s1432_s21 = sshll.u32 %s314_s23, 7 }
  0x52   : > { %s2341_s8 = scalar_lea.vmem [#allocation9], %s1432_s21 }
  0x53   : > { %1985 = dma.done.wait (%p2300_p8), %s303_s12, 2048  }
  0x54   : > { %1987 = vsyncadd (%p2300_p8), %s303_s12, 4294965248 }
  0x55   : > { %1989 = dma.done.wait (%p60_p12), [#allocation11], 2048  }
  0x56   : > { %1991 = vsyncadd (%p60_p12), [#allocation11], 4294965248  ;;  %s2351_s28 = scalar_lea.vmem [#allocation12], %s1432_s21  ;;  %p1435_p9 = scmp.ne.s32.totalorder %s2034_s27, 0 }
  0x58   : > { %366 = sbr.rel (%p1435_p9) target bundleno = 126 (0x7e), region = 60 }
  0x5d   : > { %v2057_v0 = vmov 0.0   ;;  %vm383_vm0 = vcmask 7168  }
  0x5e   : > { %367 = vst [vmem:[#allocation2 + $0x30] sm:$0xff] %v2057_v0 }
  0x5f   : > { %368 = vst [vmem:[#allocation2] sm:$0xff] %v2057_v0 }
  0x60   : > { %369 = vst [vmem:[#allocation2 + $0x58] sm:$0xff] %v2057_v0 }
  0x61   : > { %370 = vst [vmem:[#allocation2 + $0x18] sm:$0xff] %v2057_v0 }
  0x62   : > { %371 = vst [vmem:[#allocation2 + $0x50] sm:$0xff] %v2057_v0 }
  0x63   : > { %372 = vst [vmem:[#allocation2 + $0x68] sm:$0xff] %v2057_v0 }
  0x64   : > { %373 = vst [vmem:[#allocation2 + $0x8] sm:$0xff] %v2057_v0 }
  0x65   : > { %374 = vst [vmem:[#allocation2 + $0x48] sm:$0xff] %v2057_v0 }
  0x66   : > { %375 = vst [vmem:[#allocation2 + $0x40] sm:$0xff] %v2057_v0 }
  0x67   : > { %376 = vst [vmem:[#allocation2 + $0x20] sm:$0xff] %v2057_v0 }
  0x68   : > { %377 = vst [vmem:[#allocation2 + $0x10] sm:$0xff] %v2057_v0 }
  0x69   : > { %378 = vst [vmem:[#allocation2 + $0x38] sm:$0xff] %v2057_v0 }
  0x6a   : > { %379 = vst [vmem:[#allocation2 + $0x60] sm:$0xff] %v2057_v0 }
  0x6b   : > { %380 = vst [vmem:[#allocation2 + $0x70] sm:$0xff] %v2057_v0 }
  0x6c   : > { %381 = vst [vmem:[#allocation2 + $0x78] sm:$0xff] %v2057_v0 }
  0x6d   : > { %382 = vst [vmem:[#allocation2 + $0x28] sm:$0xff] %v2057_v0 }
  0x6e   : > { %384 = vst.msk [vmem:[#allocation3] sm:$0xff] %vm383_vm0, %v2057_v0 }
  0x6f   : > { %385 = vst.msk [vmem:[#allocation3 + $0x8] sm:$0xff] %vm383_vm0, %v2057_v0 }
  0x70   : > { %386 = vst.msk [vmem:[#allocation3 + $0x10] sm:$0xff] %vm383_vm0, %v2057_v0 }
  0x71   : > { %387 = vst.msk [vmem:[#allocation3 + $0x18] sm:$0xff] %vm383_vm0, %v2057_v0 }
  0x72   : > { %388 = vst.msk [vmem:[#allocation3 + $0x20] sm:$0xff] %vm383_vm0, %v2057_v0 }
  0x73   : > { %389 = vst.msk [vmem:[#allocation3 + $0x28] sm:$0xff] %vm383_vm0, %v2057_v0 }
  0x74   : > { %390 = vst.msk [vmem:[#allocation3 + $0x30] sm:$0xff] %vm383_vm0, %v2057_v0 }
  0x75   : > { %391 = vst.msk [vmem:[#allocation3 + $0x38] sm:$0xff] %vm383_vm0, %v2057_v0 }
  0x76   : > { %392 = vst.msk [vmem:[#allocation3 + $0x40] sm:$0xff] %vm383_vm0, %v2057_v0 }
  0x77   : > { %393 = vst.msk [vmem:[#allocation3 + $0x48] sm:$0xff] %vm383_vm0, %v2057_v0 }
  0x78   : > { %394 = vst.msk [vmem:[#allocation3 + $0x50] sm:$0xff] %vm383_vm0, %v2057_v0 }
  0x79   : > { %395 = vst.msk [vmem:[#allocation3 + $0x58] sm:$0xff] %vm383_vm0, %v2057_v0 }
  0x7a   : > { %396 = vst.msk [vmem:[#allocation3 + $0x60] sm:$0xff] %vm383_vm0, %v2057_v0 }
  0x7b   : > { %397 = vst.msk [vmem:[#allocation3 + $0x68] sm:$0xff] %vm383_vm0, %v2057_v0 }
  0x7c   : > { %398 = vst.msk [vmem:[#allocation3 + $0x70] sm:$0xff] %vm383_vm0, %v2057_v0 }
  0x7d   : > { %399 = vst.msk [vmem:[#allocation3 + $0x78] sm:$0xff] %vm383_vm0, %v2057_v0 }
  0x7e PF: > { %v463_v1 = vld [vmem:[%s2332_s10 + $0x78] sm:$0xff]  ;;  %v462_v2 = vld [vmem:[%s2332_s10 + $0x70] sm:$0xff]  ;;  %v461_v3 = vld [vmem:[%s2332_s10 + $0x68] sm:$0xff]  ;;  %vm625_vm1 = vcmask 7168   ;;  %p1436_p12 = scmp.ne.s32.totalorder %s2034_s27, 1 }
  0x7f   : > { %1486 = vmatpush.msra.mxu2 %v463_v1  ;;  %1487 = vmatpush.msra.mxu3 %v463_v1  ;;  %v460_v4 = vld [vmem:[%s2332_s10 + $0x60] sm:$0xff]  ;;  %v459_v5 = vld [vmem:[%s2332_s10 + $0x58] sm:$0xff]  ;;  %v458_v6 = vld [vmem:[%s2332_s10 + $0x50] sm:$0xff]  ;;  %s2992_s1 = sld [smem:[#allocation28_spill]] (!%p1436_p12) }
  0x80   : > { %464 = vmatpush.msra.mxu0 %v463_v1  ;;  %1485 = vmatpush.msra.mxu1 %v463_v1  ;;  %v457_v7 = vld [vmem:[%s2332_s10 + $0x48] sm:$0xff]  ;;  %v456_v8 = vld [vmem:[%s2332_s10 + $0x40] sm:$0xff]  ;;  %v455_v9 = vld [vmem:[%s2332_s10 + $0x38] sm:$0xff] }
  0x81   : > { %1489 = vmatpush.msra.mxu2 %v462_v2  ;;  %1490 = vmatpush.msra.mxu3 %v462_v2  ;;  %v454_v10 = vld [vmem:[%s2332_s10 + $0x30] sm:$0xff]  ;;  %v453_v11 = vld [vmem:[%s2332_s10 + $0x28] sm:$0xff]  ;;  %v452_v12 = vld [vmem:[%s2332_s10 + $0x20] sm:$0xff] }
  0x82   : > { %465 = vmatpush.msra.mxu0 %v462_v2  ;;  %1488 = vmatpush.msra.mxu1 %v462_v2  ;;  %v1447_v13 = vld [vmem:[%s2324_s13] sm:$0xff]   ;;  %v451_v14 = vld [vmem:[%s2332_s10 + $0x18] sm:$0xff]  ;;  %v450_v15 = vld [vmem:[%s2332_s10 + $0x10] sm:$0xff] }
  0x83   : > { %1492 = vmatpush.msra.mxu2 %v461_v3  ;;  %1493 = vmatpush.msra.mxu3 %v461_v3  ;;  %v1448_v16 = vunpack.c.l.bf16 %v1447_v13  ;;  %v1481_v17 = vld [vmem:[%s2324_s13 + $0x20] sm:$0xff]   ;;  %v2387_v18 = vld [vmem:[%s2324_s13 + $0x30] sm:$0xff]   ;;  %v449_v19 = vld [vmem:[%s2332_s10 + $0x8] sm:$0xff]  ;;  %v1449_v27 = vunpack.c.h.bf16 %v1447_v13 }
  0x84   : > { %466 = vmatpush.msra.mxu0 %v461_v3  ;;  %1491 = vmatpush.msra.mxu1 %v461_v3  ;;  %v448_v20 = vld [vmem:[%s2332_s10] sm:$0xff]  ;;  %v1464_v21 = vunpack.c.l.bf16 %v1481_v17  ;;  %v1472_v22 = vunpack.c.l.bf16 %v2387_v18  ;;  %v1478_v23 = vld [vmem:[%s2324_s13 + $0x8] sm:$0xff]   ;;  %v1479_v24 = vld [vmem:[%s2324_s13 + $0x10] sm:$0xff]   ;;  %v1465_v28 = vunpack.c.h.bf16 %v1481_v17  ;;  %v1473_v29 = vunpack.c.h.bf16 %v2387_v18 }
  0x85   : > { %1495 = vmatpush.msra.mxu2 %v460_v4  ;;  %1496 = vmatpush.msra.mxu3 %v460_v4  ;;  %v1452_v25 = vunpack.c.l.bf16 %v1478_v23  ;;  %v1456_v26 = vunpack.c.l.bf16 %v1479_v24  ;;  %v1480_v30 = vld [vmem:[%s2324_s13 + $0x18] sm:$0xff]   ;;  %v1453_v31 = vunpack.c.h.bf16 %v1478_v23  ;;  %v1457_v32 = vunpack.c.h.bf16 %v1479_v24  ;;  %v1482_v34 = vld [vmem:[%s2324_s13 + $0x28] sm:$0xff]   ;;  %v561_v41 = vld [vmem:[#allocation3] sm:$0xff] }
  0x86   : > { %467 = vmatpush.msra.mxu0 %v460_v4  ;;  %1494 = vmatpush.msra.mxu1 %v460_v4  ;;  %v1460_v33 = vunpack.c.l.bf16 %v1480_v30  ;;  %v1484_v35 = vld [vmem:[%s2324_s13 + $0x38] sm:$0xff]   ;;  %v1468_v36 = vunpack.c.l.bf16 %v1482_v34  ;;  %v1461_v38 = vunpack.c.h.bf16 %v1480_v30  ;;  %v1469_v39 = vunpack.c.h.bf16 %v1482_v34  ;;  %v565_v44 = vld [vmem:[#allocation3 + $0x20] sm:$0xff]  ;;  %v563_v45 = vld [vmem:[#allocation3 + $0x10] sm:$0xff] }
  0x87   : > { %1498 = vmatpush.msra.mxu2 %v459_v5  ;;  %1499 = vmatpush.msra.mxu3 %v459_v5  ;;  %v1476_v37 = vunpack.c.l.bf16 %v1484_v35  ;;  %v1477_v40 = vunpack.c.h.bf16 %v1484_v35  ;;  %v562_v47 = vld [vmem:[#allocation3 + $0x8] sm:$0xff]  ;;  %v564_v54 = vld [vmem:[#allocation3 + $0x18] sm:$0xff]  ;;  %v567_v56 = vld [vmem:[#allocation3 + $0x30] sm:$0xff] }
  0x88   : > { %468 = vmatpush.msra.mxu0 %v459_v5  ;;  %1497 = vmatpush.msra.mxu1 %v459_v5  ;;  %v566_v53 = vld [vmem:[#allocation3 + $0x28] sm:$0xff]  ;;  %v432_v57 = vld [vmem:[#allocation2 + $0x30] sm:$0xff]  ;;  %v440_v2 = vld [vmem:[#allocation2 + $0x40] sm:$0xff] }
  0x89   : > { %1501 = vmatpush.msra.mxu2 %v458_v6  ;;  %1502 = vmatpush.msra.mxu3 %v458_v6  ;;  %v436_v60 = vld [vmem:[#allocation2 + $0x50] sm:$0xff]  ;;  %v444_v3 = vld [vmem:[#allocation2 + $0x60] sm:$0xff]  ;;  %v570_v13 = vld [vmem:[#allocation3 + $0x48] sm:$0xff] }
  0x8a   : > { %469 = vmatpush.msra.mxu0 %v458_v6  ;;  %1500 = vmatpush.msra.mxu1 %v458_v6  ;;  %v437_v17 = vld [vmem:[#allocation2 + $0x68] sm:$0xff]  ;;  %v441_v23 = vld [vmem:[#allocation2 + $0x20] sm:$0xff]  ;;  %v445_v24 = vld [vmem:[#allocation2 + $0x70] sm:$0xff] }
  0x8b   : > { %1504 = vmatpush.msra.mxu2 %v457_v7  ;;  %1505 = vmatpush.msra.mxu3 %v457_v7  ;;  %v573_v34 = vld [vmem:[#allocation3 + $0x60] sm:$0xff]  ;;  %v434_v35 = vld [vmem:[#allocation2 + $0x58] sm:$0xff] }
  0x8c   : > { %470 = vmatpush.msra.mxu0 %v457_v7  ;;  %1503 = vmatpush.msra.mxu1 %v457_v7 }
  0x8d   : > { %1507 = vmatpush.msra.mxu2 %v456_v8  ;;  %1508 = vmatpush.msra.mxu3 %v456_v8 }
  0x8e   : > { %471 = vmatpush.msra.mxu0 %v456_v8  ;;  %1506 = vmatpush.msra.mxu1 %v456_v8  ;;  %v569_v8 = vld [vmem:[#allocation3 + $0x40] sm:$0xff] }
  0x8f   : > { %1510 = vmatpush.msra.mxu2 %v455_v9  ;;  %1511 = vmatpush.msra.mxu3 %v455_v9 }
  0x90   : > { %472 = vmatpush.msra.mxu0 %v455_v9  ;;  %1509 = vmatpush.msra.mxu1 %v455_v9 }
  0x91   : > { %1513 = vmatpush.msra.mxu2 %v454_v10  ;;  %1514 = vmatpush.msra.mxu3 %v454_v10 }
  0x92   : > { %473 = vmatpush.msra.mxu0 %v454_v10  ;;  %1512 = vmatpush.msra.mxu1 %v454_v10 }
  0x93   : > { %1516 = vmatpush.msra.mxu2 %v453_v11  ;;  %1517 = vmatpush.msra.mxu3 %v453_v11 }
  0x94   : > { %474 = vmatpush.msra.mxu0 %v453_v11  ;;  %1515 = vmatpush.msra.mxu1 %v453_v11  ;;  %v568_v11 = vld [vmem:[#allocation3 + $0x38] sm:$0xff] }
  0x95   : > { %1519 = vmatpush.msra.mxu2 %v452_v12  ;;  %1520 = vmatpush.msra.mxu3 %v452_v12 }
  0x96   : > { %475 = vmatpush.msra.mxu0 %v452_v12  ;;  %1518 = vmatpush.msra.mxu1 %v452_v12 }
  0x97   : > { %1522 = vmatpush.msra.mxu2 %v451_v14  ;;  %1523 = vmatpush.msra.mxu3 %v451_v14 }
  0x98   : > { %476 = vmatpush.msra.mxu0 %v451_v14  ;;  %1521 = vmatpush.msra.mxu1 %v451_v14  ;;  %v433_v14 = vld [vmem:[#allocation2] sm:$0xff] }
  0x99   : > { %1525 = vmatpush.msra.mxu2 %v450_v15  ;;  %1526 = vmatpush.msra.mxu3 %v450_v15 }
  0x9a   : > { %577 = vadd.xlane.f32.xlu0 %v1448_v16  ;;  %477 = vmatpush.msra.mxu0 %v450_v15 }
  0x9b   : > { %1528 = vmatpush.msra.mxu2 %v449_v19  ;;  %1529 = vmatpush.msra.mxu3 %v449_v19 }
  0x9c   : > { %1524 = vmatpush.msra.mxu1 %v450_v15  ;;  %478 = vmatpush.msra.mxu0 %v449_v19 }
  0x9d   : > { %1531 = vmatpush.msra.mxu2 %v448_v20  ;;  %1532 = vmatpush.msra.mxu3 %v448_v20 }
  0x9e   : > { %504 = vmatmul.f32.vlgmr.msra.gmra.mxu2 %v1464_v21  ;;  %516 = vmatmul.f32.vlgmr.msra.gmra.mxu3 %v1472_v22 }
  0x9f   : > { %1527 = vmatpush.msra.mxu1 %v449_v19  ;;  %479 = vmatpush.msra.mxu0 %v448_v20 }
  0xa0   : > { %480 = vmatmul.f32.vlgmr.msra.gmra.mxu0 %v1448_v16  ;;  %585 = vadd.xlane.f32.xlu2 %v1456_v26 }
  0xa1   : > { %1530 = vmatpush.msra.mxu1 %v448_v20  ;;  %581 = vadd.xlane.f32.xlu1 %v1452_v25 }
  0xa2   : > { %492 = vmatmul.f32.vlgmr.msra.gmra.mxu1 %v1456_v26  ;;  %579 = vadd.xlane.f32.xlu0 %v1449_v27 }
  0xa6   : > { %507 = vmatmul.f32.gmra.mxu2 %v1465_v28  ;;  %519 = vmatmul.f32.gmra.mxu3 %v1473_v29 }
  0xa8   : > { %483 = vmatmul.f32.gmra.mxu0 %v1449_v27  ;;  %587 = vadd.xlane.f32.xlu2 %v1457_v32 }
  0xa9   : > { %583 = vadd.xlane.f32.xlu1 %v1453_v31 }
  0xaa   : > { %495 = vmatmul.f32.gmra.mxu1 %v1457_v32  ;;  %589 = vadd.xlane.f32.xlu0 %v1460_v33  ;;  %v571_v32 = vld [vmem:[#allocation3 + $0x50] sm:$0xff] }
  0xae   : > { %510 = vmatmul.f32.gmra.mxu2 %v1468_v36  ;;  %522 = vmatmul.f32.gmra.mxu3 %v1476_v37 }
  0xb0   : > { %486 = vmatmul.f32.gmra.mxu0 %v1452_v25  ;;  %593 = vadd.xlane.f32.xlu2 %v1464_v21 }
  0xb1   : > { %591 = vadd.xlane.f32.xlu1 %v1461_v38 }
  0xb2   : > { %498 = vmatmul.f32.gmra.mxu1 %v1460_v33  ;;  %595 = vadd.xlane.f32.xlu0 %v1465_v28 }
  0xb6   : > { %513 = vmatmul.f32.gmra.mxu2 %v1469_v39  ;;  %525 = vmatmul.f32.gmra.mxu3 %v1477_v40 }
  0xb8   : > { %489 = vmatmul.f32.gmra.mxu0 %v1453_v31  ;;  %599 = vadd.xlane.f32.xlu2 %v1469_v39 }
  0xb9   : > { %597 = vadd.xlane.f32.xlu1 %v1468_v36 }
  0xba   : > { %501 = vmatmul.f32.gmra.mxu1 %v1461_v38  ;;  %601 = vadd.xlane.f32.xlu0 %v1472_v22  ;;  %v438_v38 = vld [vmem:[#allocation2 + $0x8] sm:$0xff] }
  0xc0   : > { %605 = vadd.xlane.f32.xlu2 %v1476_v37 }
  0xc1   : > { %603 = vadd.xlane.f32.xlu1 %v1473_v29  ;;  %v572_v29 = vld [vmem:[#allocation3 + $0x58] sm:$0xff] }
  0xc2   : > { %607 = vadd.xlane.f32.xlu0 %v1477_v40 }
 0x10d   : > { %v578_v42 = vpop.xlane.xlu0 %577 }
 0x10e   : > { %v609_v43 = vadd.f32 %v578_v42, %v561_v41 }
 0x110   : > { %626 = vst.msk [vmem:[#allocation3] sm:$0xff] %vm625_vm1, %v609_v43 }
 0x113   : > { %v586_v46 = vpop.xlane.xlu2 %585 }
 0x114   : > { %v613_v48 = vadd.f32 %v586_v46, %v565_v44  ;;  %v582_v49 = vpop.xlane.xlu1 %581  ;;  %v442_v44 = vld [vmem:[#allocation2 + $0x10] sm:$0xff] }
 0x115   : > { %v611_v50 = vadd.f32 %v582_v49, %v563_v45  ;;  %v580_v51 = vpop.xlane.xlu0 %579  ;;  %v446_v45 = vld [vmem:[#allocation2 + $0x78] sm:$0xff] }
 0x116   : > { %630 = vst.msk [vmem:[#allocation3 + $0x20] sm:$0xff] %vm625_vm1, %v613_v48  ;;  %v610_v52 = vadd.f32 %v580_v51, %v562_v47 }
 0x117   : > { %628 = vst.msk [vmem:[#allocation3 + $0x10] sm:$0xff] %vm625_vm1, %v611_v50  ;;  %v575_v50 = vld [vmem:[#allocation3 + $0x70] sm:$0xff] }
 0x118   : > { %627 = vst.msk [vmem:[#allocation3 + $0x8] sm:$0xff] %vm625_vm1, %v610_v52 }
 0x11b   : > { %v588_v55 = vpop.xlane.xlu2 %587 }
 0x11c   : > { %v614_v58 = vadd.f32 %v588_v55, %v566_v53  ;;  %v584_v59 = vpop.xlane.xlu1 %583  ;;  %v574_v53 = vld [vmem:[#allocation3 + $0x68] sm:$0xff]  ;;  %v576_v55 = vld [vmem:[#allocation3 + $0x78] sm:$0xff] }
 0x11d   : > { %v612_v61 = vadd.f32 %v584_v59, %v564_v54  ;;  %v590_v62 = vpop.xlane.xlu0 %589  ;;  %v481_v63 = vpop.f32.mrf.mxu0  ;;  %v439_v59 = vld [vmem:[#allocation2 + $0x48] sm:$0xff] }
 0x11e   : > { %631 = vst.msk [vmem:[#allocation3 + $0x28] sm:$0xff] %vm625_vm1, %v614_v58  ;;  %v615_v0 = vadd.f32 %v590_v62, %v567_v56  ;;  %v529_v1 = vadd.f32 %v481_v63, %v432_v57  ;;  %v435_v56 = vld [vmem:[#allocation2 + $0x18] sm:$0xff] }
 0x11f   : > { %v493_v4 = vpop.f32.mrf.mxu1  ;;  %629 = vst.msk [vmem:[#allocation3 + $0x18] sm:$0xff] %vm625_vm1, %v612_v61 }
 0x120   : > { %v533_v5 = vadd.f32 %v493_v4, %v436_v60  ;;  %632 = vst.msk [vmem:[#allocation3 + $0x30] sm:$0xff] %vm625_vm1, %v615_v0 }
 0x121   : > { %v505_v6 = vpop.f32.mrf.mxu2  ;;  %v517_v7 = vpop.f32.mrf.mxu3  ;;  %545 = vst [vmem:[#allocation2 + $0x30] sm:$0xff] %v529_v1  ;;  %v443_v1 = vld [vmem:[#allocation2 + $0x38] sm:$0xff] }
 0x122   : > { %v537_v9 = vadd.f32 %v505_v6, %v440_v2  ;;  %v541_v10 = vadd.f32 %v517_v7, %v444_v3  ;;  %549 = vst [vmem:[#allocation2 + $0x50] sm:$0xff] %v533_v5  ;;  %v447_v2 = vld [vmem:[#allocation2 + $0x28] sm:$0xff] }
 0x123   : > { %v594_v12 = vpop.xlane.xlu2 %593 }
 0x124   : > { %553 = vst [vmem:[#allocation2 + $0x40] sm:$0xff] %v537_v9  ;;  %v617_v15 = vadd.f32 %v594_v12, %v569_v8  ;;  %v592_v16 = vpop.xlane.xlu1 %591 }
 0x125   : > { %557 = vst [vmem:[#allocation2 + $0x60] sm:$0xff] %v541_v10  ;;  %v616_v18 = vadd.f32 %v592_v16, %v568_v11  ;;  %v596_v19 = vpop.xlane.xlu0 %595  ;;  %v484_v20 = vpop.f32.mrf.mxu0 }
 0x126   : > { %634 = vst.msk [vmem:[#allocation3 + $0x40] sm:$0xff] %vm625_vm1, %v617_v15  ;;  %v618_v21 = vadd.f32 %v596_v19, %v570_v13  ;;  %v530_v22 = vadd.f32 %v484_v20, %v433_v14 }
 0x127   : > { %v496_v25 = vpop.f32.mrf.mxu1  ;;  %633 = vst.msk [vmem:[#allocation3 + $0x38] sm:$0xff] %vm625_vm1, %v616_v18 }
 0x128   : > { %v534_v26 = vadd.f32 %v496_v25, %v437_v17  ;;  %635 = vst.msk [vmem:[#allocation3 + $0x48] sm:$0xff] %vm625_vm1, %v618_v21 }
 0x129   : > { %v508_v27 = vpop.f32.mrf.mxu2  ;;  %v520_v28 = vpop.f32.mrf.mxu3  ;;  %546 = vst [vmem:[#allocation2] sm:$0xff] %v530_v22 }
 0x12a   : > { %v538_v30 = vadd.f32 %v508_v27, %v441_v23  ;;  %v542_v31 = vadd.f32 %v520_v28, %v445_v24  ;;  %550 = vst [vmem:[#allocation2 + $0x68] sm:$0xff] %v534_v26 }
 0x12b   : > { %v600_v33 = vpop.xlane.xlu2 %599 }
 0x12c   : > { %554 = vst [vmem:[#allocation2 + $0x20] sm:$0xff] %v538_v30  ;;  %v620_v36 = vadd.f32 %v600_v33, %v572_v29  ;;  %v598_v37 = vpop.xlane.xlu1 %597 }
 0x12d   : > { %558 = vst [vmem:[#allocation2 + $0x70] sm:$0xff] %v542_v31  ;;  %v619_v39 = vadd.f32 %v598_v37, %v571_v32  ;;  %v602_v40 = vpop.xlane.xlu0 %601  ;;  %v487_v41 = vpop.f32.mrf.mxu0 }
 0x12e   : > { %637 = vst.msk [vmem:[#allocation3 + $0x58] sm:$0xff] %vm625_vm1, %v620_v36  ;;  %v621_v42 = vadd.f32 %v602_v40, %v573_v34  ;;  %v531_v43 = vadd.f32 %v487_v41, %v434_v35 }
 0x12f   : > { %v499_v46 = vpop.f32.mrf.mxu1  ;;  %636 = vst.msk [vmem:[#allocation3 + $0x50] sm:$0xff] %vm625_vm1, %v619_v39 }
 0x130   : > { %v535_v47 = vadd.f32 %v499_v46, %v438_v38  ;;  %638 = vst.msk [vmem:[#allocation3 + $0x60] sm:$0xff] %vm625_vm1, %v621_v42 }
 0x131   : > { %v511_v48 = vpop.f32.mrf.mxu2  ;;  %v523_v49 = vpop.f32.mrf.mxu3  ;;  %547 = vst [vmem:[#allocation2 + $0x58] sm:$0xff] %v531_v43 }
 0x132   : > { %v539_v51 = vadd.f32 %v511_v48, %v442_v44  ;;  %v543_v52 = vadd.f32 %v523_v49, %v446_v45  ;;  %551 = vst [vmem:[#allocation2 + $0x8] sm:$0xff] %v535_v47 }
 0x133   : > { %v606_v54 = vpop.xlane.xlu2 %605 }
 0x134   : > { %555 = vst [vmem:[#allocation2 + $0x10] sm:$0xff] %v539_v51  ;;  %v623_v57 = vadd.f32 %v606_v54, %v575_v50  ;;  %v604_v58 = vpop.xlane.xlu1 %603 }
 0x135   : > { %559 = vst [vmem:[#allocation2 + $0x78] sm:$0xff] %v543_v52  ;;  %v622_v60 = vadd.f32 %v604_v58, %v574_v53  ;;  %v608_v61 = vpop.xlane.xlu0 %607  ;;  %v490_v62 = vpop.f32.mrf.mxu0 }
 0x136   : > { %640 = vst.msk [vmem:[#allocation3 + $0x70] sm:$0xff] %vm625_vm1, %v623_v57  ;;  %v624_v63 = vadd.f32 %v608_v61, %v576_v55  ;;  %v532_v0 = vadd.f32 %v490_v62, %v435_v56 }
 0x137   : > { %v502_v3 = vpop.f32.mrf.mxu1  ;;  %639 = vst.msk [vmem:[#allocation3 + $0x68] sm:$0xff] %vm625_vm1, %v622_v60 }
 0x138   : > { %v536_v4 = vadd.f32 %v502_v3, %v439_v59  ;;  %641 = vst.msk [vmem:[#allocation3 + $0x78] sm:$0xff] %vm625_vm1, %v624_v63 }
 0x139   : > { %v514_v5 = vpop.f32.mrf.mxu2  ;;  %v526_v6 = vpop.f32.mrf.mxu3  ;;  %548 = vst [vmem:[#allocation2 + $0x18] sm:$0xff] %v532_v0  ;;  %645 = sbr.rel (%p1436_p12) target bundleno = 651 (0x28b), region = 64 }
 0x13a   : > { %v540_v7 = vadd.f32 %v514_v5, %v443_v1  ;;  %v544_v8 = vadd.f32 %v526_v6, %v447_v2  ;;  %552 = vst [vmem:[#allocation2 + $0x48] sm:$0xff] %v536_v4 }
 0x13c   : > { %556 = vst [vmem:[#allocation2 + $0x38] sm:$0xff] %v540_v7 }
 0x13d   : > { %560 = vst [vmem:[#allocation2 + $0x28] sm:$0xff] %v544_v8 }
 0x13e   : > { %v2415_v9 = vld [vmem:[#allocation3 + $0x48] sm:$0xff]  ;;  %v654_v10 = vld [vmem:[#allocation3 + $0x40] sm:$0xff]  ;;  %v2058_v12 = vmov 0   ;;  %v656_v22 = vld [vmem:[#allocation3 + $0x50] sm:$0xff] }
 0x13f   : > { %v646_v11 = vld [vmem:[#allocation3] sm:$0xff]  ;;  %1738 = vset.pattern.permute.xlu2 %v2058_v12  ;;  %1737 = vset.pattern.permute.xlu1 %v2058_v12  ;;  %v687_v13 = vmax.f32 %v2415_v9, 1.0  ;;  %v686_v14 = vmax.f32 %v654_v10, 1.0  ;;  %v659_v16 = vld [vmem:[#allocation3 + $0x68] sm:$0xff]  ;;  %v688_v25 = vmax.f32 %v656_v22, 1.0  ;;  %v660_v28 = vld [vmem:[#allocation3 + $0x70] sm:$0xff] }
 0x140   : > { %v678_v15 = vmax.f32 %v646_v11, 1.0  ;;  %1736 = vset.pattern.permute.xlu0 %v2058_v12  ;;  %v658_v17 = vld [vmem:[#allocation3 + $0x60] sm:$0xff]  ;;  %v691_v19 = vmax.f32 %v659_v16, 1.0  ;;  %v647_v23 = vld [vmem:[#allocation3 + $0x8] sm:$0xff]  ;;  %vm1022_vm3 = vcmp.gt.f32.partialorder %v654_v10, 0.0  ;;  %v692_v29 = vmax.f32 %v660_v28, 1.0 }
 0x141   : > { %741 = vperm.xlu2 %1738, %v687_v13   ;;  %736 = vperm.xlu0 %1736, %v686_v14   ;;  %v650_v18 = vld [vmem:[#allocation3 + $0x20] sm:$0xff]  ;;  %v690_v20 = vmax.f32 %v658_v17, 1.0  ;;  %v651_v24 = vld [vmem:[#allocation3 + $0x28] sm:$0xff]  ;;  %v679_v26 = vmax.f32 %v647_v23, 1.0  ;;  %vm1026_vm2 = vcmp.gt.f32.partialorder %v658_v17, 0.0  ;;  %v1054_v31 = vsel %vm1022_vm3, 1, %v2058_v12 }
 0x142   : > { %696 = vperm.xlu1 %1737, %v678_v15   ;;  %v682_v21 = vmax.f32 %v650_v18, 1.0  ;;  %v683_v27 = vmax.f32 %v651_v24, 1.0  ;;  %v1058_v30 = vsel %vm1026_vm2, 1, %v2058_v12  ;;  %v657_v32 = vld [vmem:[#allocation3 + $0x58] sm:$0xff]  ;;  %v648_v33 = vld [vmem:[#allocation3 + $0x10] sm:$0xff]  ;;  %vm1018_vm4 = vcmp.gt.f32.partialorder %v650_v18, 0.0 }
 0x143   : > { %v652_v34 = vld [vmem:[#allocation3 + $0x30] sm:$0xff]  ;;  %v689_v35 = vmax.f32 %v657_v32, 1.0  ;;  %v680_v36 = vmax.f32 %v648_v33, 1.0  ;;  %v661_v38 = vld [vmem:[#allocation3 + $0x78] sm:$0xff]  ;;  %vm1014_vm5 = vcmp.gt.f32.partialorder %v646_v11, 0.0  ;;  %v1050_v40 = vsel %vm1018_vm4, 1, %v2058_v12 }
 0x144   : > { %v684_v37 = vmax.f32 %v652_v34, 1.0  ;;  %v693_v39 = vmax.f32 %v661_v38, 1.0  ;;  %v1046_v41 = vsel %vm1014_vm5, 1, %v2058_v12  ;;  %v649_v42 = vld [vmem:[#allocation3 + $0x18] sm:$0xff]  ;;  %vm1023_vm6 = vcmp.gt.f32.partialorder %v2415_v9, 0.0  ;;  %v1156_v59 = vld [vmem:[#allocation10 + $0x70] sm:$0xff] }
 0x145   : > { %vm1027_vm7 = vcmp.gt.f32.partialorder %v659_v16, 0.0  ;;  %v681_v43 = vmax.f32 %v649_v42, 1.0  ;;  %v1055_v44 = vsel %vm1023_vm6, 1, %v2058_v12  ;;  %v653_v46 = vld [vmem:[#allocation3 + $0x38] sm:$0xff]  ;;  %vm1019_vm8 = vcmp.gt.f32.partialorder %v651_v24, 0.0  ;;  %v1155_v60 = vld [vmem:[#allocation10 + $0x68] sm:$0xff] }
 0x146   : > { %v1059_v45 = vsel %vm1027_vm7, 1, %v2058_v12  ;;  %vm1015_vm9 = vcmp.gt.f32.partialorder %v647_v23, 0.0  ;;  %v685_v47 = vmax.f32 %v653_v46, 1.0  ;;  %v1051_v48 = vsel %vm1019_vm8, 1, %v2058_v12  ;;  %v1157_v58 = vld [vmem:[#allocation10 + $0x78] sm:$0xff]  ;;  %v1154_v61 = vld [vmem:[#allocation10 + $0x60] sm:$0xff] }
 0x147   : > { %v1047_v49 = vsel %vm1015_vm9, 1, %v2058_v12  ;;  %vm1016_vm10 = vcmp.gt.f32.partialorder %v648_v33, 0.0  ;;  %vm1024_vm11 = vcmp.gt.f32.partialorder %v656_v22, 0.0  ;;  %vm1028_vm12 = vcmp.gt.f32.partialorder %v660_v28, 0.0  ;;  %1534 = vmatpush.msra.mxu2 %v1157_v58  ;;  %1533 = vmatpush.msra.mxu1 %v1157_v58  ;;  %v1153_v62 = vld [vmem:[#allocation10 + $0x58] sm:$0xff]  ;;  %v1152_v63 = vld [vmem:[#allocation10 + $0x50] sm:$0xff] }
 0x148   : > { %v1048_v50 = vsel %vm1016_vm10, 1, %v2058_v12  ;;  %v1056_v51 = vsel %vm1024_vm11, 1, %v2058_v12  ;;  %v1060_v52 = vsel %vm1028_vm12, 1, %v2058_v12  ;;  %vm1029_vm13 = vcmp.gt.f32.partialorder %v661_v38, 0.0  ;;  %1535 = vmatpush.msra.mxu3 %v1157_v58  ;;  %1162 = vmatpush.msra.mxu0 %v1157_v58  ;;  %v1151_v1 = vld [vmem:[#allocation10 + $0x48] sm:$0xff]  ;;  %v1150_v2 = vld [vmem:[#allocation10 + $0x40] sm:$0xff] }
 0x149   : > { %761 = vperm.xlu2 %1738, %v691_v19   ;;  %756 = vperm.xlu0 %1736, %v690_v20   ;;  %vm1020_vm14 = vcmp.gt.f32.partialorder %v652_v34, 0.0  ;;  %vm1025_vm15 = vcmp.gt.f32.partialorder %v657_v32, 0.0  ;;  %v1061_v53 = vsel %vm1029_vm13, 1, %v2058_v12  ;;  %vm1017_vm0 = vcmp.gt.f32.partialorder %v649_v42, 0.0  ;;  %v1149_v3 = vld [vmem:[#allocation10 + $0x38] sm:$0xff]  ;;  %v1148_v5 = vld [vmem:[#allocation10 + $0x30] sm:$0xff] }
 0x14a   : > { %716 = vperm.xlu1 %1737, %v682_v21   ;;  %v1052_v54 = vsel %vm1020_vm14, 1, %v2058_v12  ;;  %v1057_v55 = vsel %vm1025_vm15, 1, %v2058_v12  ;;  %vm1021_vm1 = vcmp.gt.f32.partialorder %v653_v46, 0.0  ;;  %v1049_v56 = vsel %vm1017_vm0, 1, %v2058_v12  ;;  %1537 = vmatpush.msra.mxu2 %v1156_v59  ;;  %v1147_v6 = vld [vmem:[#allocation10 + $0x28] sm:$0xff]  ;;  %v1146_v7 = vld [vmem:[#allocation10 + $0x20] sm:$0xff] }
 0x14b   : > { %v1053_v57 = vsel %vm1021_vm1, 1, %v2058_v12  ;;  %1536 = vmatpush.msra.mxu1 %v1156_v59  ;;  %1538 = vmatpush.msra.mxu3 %v1156_v59  ;;  %v1145_v8 = vld [vmem:[#allocation10 + $0x18] sm:$0xff]  ;;  %v1144_v10 = vld [vmem:[#allocation10 + $0x10] sm:$0xff]  ;;  %v1143_v11 = vld [vmem:[#allocation10 + $0x8] sm:$0xff] }
 0x14c   : > { %1540 = vmatpush.msra.mxu2 %v1155_v60  ;;  %1163 = vmatpush.msra.mxu0 %v1156_v59  ;;  %v1142_v12 = vld [vmem:[#allocation10] sm:$0xff] }
 0x14d   : > { %1539 = vmatpush.msra.mxu1 %v1155_v60  ;;  %1541 = vmatpush.msra.mxu3 %v1155_v60 }
 0x14e   : > { %1543 = vmatpush.msra.mxu2 %v1154_v61  ;;  %1164 = vmatpush.msra.mxu0 %v1155_v60 }
 0x14f   : > { %1542 = vmatpush.msra.mxu1 %v1154_v61  ;;  %1544 = vmatpush.msra.mxu3 %v1154_v61 }
 0x150   : > { %1546 = vmatpush.msra.mxu2 %v1153_v62  ;;  %1165 = vmatpush.msra.mxu0 %v1154_v61  ;;  %v670_v61 = vld [vmem:[#allocation2 + $0x40] sm:$0xff] }
 0x151   : > { %746 = vperm.xlu2 %1738, %v688_v25   ;;  %701 = vperm.xlu0 %1736, %v679_v26  }
 0x152   : > { %721 = vperm.xlu1 %1737, %v683_v27   ;;  %1545 = vmatpush.msra.mxu1 %v1153_v62 }
 0x153   : > { %1547 = vmatpush.msra.mxu3 %v1153_v62  ;;  %1549 = vmatpush.msra.mxu2 %v1152_v63 }
 0x154   : > { %1548 = vmatpush.msra.mxu1 %v1152_v63  ;;  %1166 = vmatpush.msra.mxu0 %v1153_v62 }
 0x155   : > { %1550 = vmatpush.msra.mxu3 %v1152_v63  ;;  %1552 = vmatpush.msra.mxu2 %v1151_v1 }
 0x156   : > { %1551 = vmatpush.msra.mxu1 %v1151_v1  ;;  %1167 = vmatpush.msra.mxu0 %v1152_v63 }
 0x157   : > { %1553 = vmatpush.msra.mxu3 %v1151_v1  ;;  %1555 = vmatpush.msra.mxu2 %v1150_v2 }
 0x158   : > { %1168 = vmatpush.msra.mxu0 %v1151_v1  ;;  %1554 = vmatpush.msra.mxu1 %v1150_v2 }
 0x159   : > { %1099 = vperm.xlu2 %1738, %v1058_v30   ;;  %766 = vperm.xlu0 %1736, %v692_v29  }
 0x15a   : > { %1087 = vperm.xlu1 %1737, %v1054_v31   ;;  %1556 = vmatpush.msra.mxu3 %v1150_v2 }
 0x15b   : > { %1169 = vmatpush.msra.mxu0 %v1150_v2  ;;  %1558 = vmatpush.msra.mxu2 %v1149_v3 }
 0x15c   : > { %1557 = vmatpush.msra.mxu1 %v1149_v3  ;;  %1559 = vmatpush.msra.mxu3 %v1149_v3 }
 0x15d   : > { %1170 = vmatpush.msra.mxu0 %v1149_v3  ;;  %1561 = vmatpush.msra.mxu2 %v1148_v5 }
 0x15e   : > { %1560 = vmatpush.msra.mxu1 %v1148_v5  ;;  %1562 = vmatpush.msra.mxu3 %v1148_v5 }
 0x15f   : > { %1171 = vmatpush.msra.mxu0 %v1148_v5  ;;  %1564 = vmatpush.msra.mxu2 %v1147_v6 }
 0x160   : > { %1563 = vmatpush.msra.mxu1 %v1147_v6  ;;  %1565 = vmatpush.msra.mxu3 %v1147_v6 }
 0x161   : > { %751 = vperm.xlu2 %1738, %v689_v35   ;;  %706 = vperm.xlu0 %1736, %v680_v36  }
 0x162   : > { %726 = vperm.xlu1 %1737, %v684_v37   ;;  %1172 = vmatpush.msra.mxu0 %v1147_v6 }
 0x163   : > { %1567 = vmatpush.msra.mxu2 %v1146_v7  ;;  %1566 = vmatpush.msra.mxu1 %v1146_v7 }
 0x164   : > { %1568 = vmatpush.msra.mxu3 %v1146_v7  ;;  %1173 = vmatpush.msra.mxu0 %v1146_v7 }
 0x165   : > { %1570 = vmatpush.msra.mxu2 %v1145_v8  ;;  %1569 = vmatpush.msra.mxu1 %v1145_v8 }
 0x166   : > { %1571 = vmatpush.msra.mxu3 %v1145_v8  ;;  %1174 = vmatpush.msra.mxu0 %v1145_v8  ;;  %v1038_v8 = vld [vmem:[%s2341_s8 + $0x40] sm:$0xff] }
 0x167   : > { %1573 = vmatpush.msra.mxu2 %v1144_v10  ;;  %1572 = vmatpush.msra.mxu1 %v1144_v10 }
 0x168   : > { %1574 = vmatpush.msra.mxu3 %v1144_v10  ;;  %1175 = vmatpush.msra.mxu0 %v1144_v10 }
 0x169   : > { %1075 = vperm.xlu2 %1738, %v1050_v40   ;;  %771 = vperm.xlu0 %1736, %v693_v39  }
 0x16a   : > { %1063 = vperm.xlu1 %1737, %v1046_v41   ;;  %1576 = vmatpush.msra.mxu2 %v1143_v11 }
 0x16b   : > { %1575 = vmatpush.msra.mxu1 %v1143_v11  ;;  %1577 = vmatpush.msra.mxu3 %v1143_v11 }
 0x16c   : > { %1176 = vmatpush.msra.mxu0 %v1143_v11  ;;  %1579 = vmatpush.msra.mxu2 %v1142_v12 }
 0x16d   : > { %1578 = vmatpush.msra.mxu1 %v1142_v12  ;;  %1580 = vmatpush.msra.mxu3 %v1142_v12 }
 0x16e   : > { %1177 = vmatpush.msra.mxu0 %v1142_v12 }
 0x171   : > { %711 = vperm.xlu2 %1738, %v681_v43   ;;  %1090 = vperm.xlu0 %1736, %v1055_v44  }
 0x172   : > { %1102 = vperm.xlu1 %1737, %v1059_v45  }
 0x179   : > { %1078 = vperm.xlu2 %1738, %v1051_v48   ;;  %731 = vperm.xlu0 %1736, %v685_v47  }
 0x17a   : > { %1066 = vperm.xlu1 %1737, %v1047_v49  }
 0x181   : > { %1069 = vperm.xlu2 %1738, %v1048_v50   ;;  %1093 = vperm.xlu0 %1736, %v1056_v51  }
 0x182   : > { %1105 = vperm.xlu1 %1737, %v1060_v52  }
 0x189   : > { %1108 = vperm.xlu2 %1738, %v1061_v53   ;;  %1081 = vperm.xlu0 %1736, %v1052_v54  }
 0x18a   : > { %1096 = vperm.xlu1 %1737, %v1057_v55  }
 0x191   : > { %1072 = vperm.xlu0 %1736, %v1049_v56  }
 0x192   : > { %1084 = vperm.xlu1 %1737, %v1053_v57  }
 0x19b   : > { %v2438_v0 = vpop.permute.xlu2 %741 }
 0x19c   : > { %1740 = vrcp.f32 %v2438_v0  ;;  %v920_v30 = vand.u32 2147483648, %v2438_v0  ;;  %v918_v46 = vand.u32 2147483647, %v2438_v0  ;;  %vm914_vm5 = vweird.f32 %v2438_v0 }
 0x19e   : > { %v2500_v50 = vor.u32 1.1754944e-38, %v920_v30 }
 0x1a2   : > { %v2450_v16 = vpop.eup %1740 }
 0x1a3   : > { %v2440_v4 = vpop.permute.xlu2 %761  ;;  %v910_v21 = vmul.f32 %v2450_v16, %v2438_v0  ;;  %vm915_vm6 = vweird.f32 %v2450_v16 }
 0x1a4   : > { %v980_v51 = vand.u32 2147483648, %v2440_v4  ;;  %vm974_vm11 = vweird.f32 %v2440_v4 }
 0x1a5   : > { %v911_v25 = vsub.f32 1.0, %v910_v21 }
 0x1a7   : > { %v912_v32 = vmul.f32 %v2450_v16, %v911_v25  ;;  %v666_v25 = vld [vmem:[#allocation2 + $0x50] sm:$0xff] }
 0x1a9   : > { %v2504_v53 = vadd.f32 %v2450_v16, %v912_v32 }
 0x1ab   : > { %v2442_v9 = vpop.permute.xlu2 %746 }
 0x1b3   : > { %v2445_v13 = vpop.permute.xlu2 %1099  ;;  %v737_v14 = vpop.permute.xlu0 %736 }
 0x1b4   : > { %1742 = vrcp.f32 %v737_v14  ;;  %v2447_v15 = vpop.permute.xlu1 %696  ;;  %vm899_vm3 = vweird.f32 %v737_v14  ;;  %v903_v39 = vand.u32 2147483647, %v737_v14  ;;  %v905_v40 = vand.u32 2147483648, %v737_v14 }
 0x1b5   : > { %1744 = vrcp.f32 %v2440_v4  ;;  %vm1122_vm8 = vcmp.eq.s32.totalorder %v2445_v13, 1  ;;  %v785_v57 = vand.u32 2147483648, %v2447_v15 }
 0x1b6   : > { %1746 = vrcp.f32 %v2447_v15  ;;  %v906_v52 = vor.u32 1.1754944e-38, %v905_v40  ;;  %vm904_vm7 = vcmp.eq.f32.partialorder %v903_v39, 8.507059e+37 }
 0x1ba   : > { %v1743_v17 = vpop.eup %1742 }
 0x1bb   : > { %v895_v18 = vmul.f32 %v1743_v17, %v737_v14  ;;  %v2452_v19 = vpop.permute.xlu2 %751  ;;  %v2454_v20 = vpop.permute.xlu0 %756  ;;  %vm900_vm2 = vweird.f32 %v1743_v17 }
 0x1bc   : > { %v2459_v22 = vpop.permute.xlu1 %716  ;;  %1748 = vrcp.f32 %v2454_v20  ;;  %v2462_v24 = vpop.eup %1744  ;;  %vm2492_vm4 = vmor %vm899_vm3, %vm900_vm2  ;;  %v965_v58 = vand.u32 2147483648, %v2454_v20  ;;  %v963_v1 = vand.u32 2147483647, %v2454_v20  ;;  %vm959_vm12 = vweird.f32 %v2454_v20 }
 0x1bd   : > { %v896_v23 = vsub.f32 1.0, %v895_v18  ;;  %1750 = vrcp.f32 %v2459_v22  ;;  %v970_v27 = vmul.f32 %v2462_v24, %v2440_v4  ;;  %v2468_v28 = vpop.eup %1746  ;;  %v845_v2 = vand.u32 2147483648, %v2459_v22 }
 0x1be   : > { %1752 = vrcp.f32 %v2442_v9  ;;  %v775_v41 = vmul.f32 %v2468_v28, %v2447_v15  ;;  %v843_v6 = vand.u32 2147483647, %v2459_v22  ;;  %vm839_vm13 = vweird.f32 %v2459_v22 }
 0x1bf   : > { %v897_v26 = vmul.f32 %v1743_v17, %v896_v23  ;;  %v971_v38 = vsub.f32 1.0, %v970_v27  ;;  %v674_v23 = vld [vmem:[#allocation2 + $0x60] sm:$0xff]  ;;  %vm964_vm1 = vcmp.eq.f32.partialorder %v963_v1, 8.507059e+37  ;;  %vm780_vm3 = vweird.f32 %v2468_v28 }
 0x1c0   : > { %v776_v56 = vsub.f32 1.0, %v775_v41  ;;  %vm844_vm2 = vcmp.eq.f32.partialorder %v843_v6, 8.507059e+37 }
 0x1c1   : > { %v898_v36 = vadd.f32 %v1743_v17, %v897_v26  ;;  %v2509_v54 = vmul.f32 %v2462_v24, %v971_v38  ;;  %v1034_v38 = vld [vmem:[%s2341_s8 + $0x20] sm:$0xff] }
 0x1c2   : > { %v2470_v29 = vpop.eup %1748  ;;  %v777_v10 = vmul.f32 %v2468_v28, %v776_v56 }
 0x1c3   : > { %v2473_v31 = vpop.permute.xlu0 %701  ;;  %v955_v33 = vmul.f32 %v2470_v29, %v2454_v20  ;;  %v2478_v34 = vpop.permute.xlu2 %1075  ;;  %v902_v49 = vsel %vm2492_vm4, %v1743_v17, %v898_v36  ;;  %vm960_vm9 = vweird.f32 %v2470_v29  ;;  %v966_v17 = vor.u32 1.1754944e-38, %v965_v58 }
 0x1c4   : > { %v2480_v35 = vpop.permute.xlu1 %721  ;;  %v2482_v37 = vpop.eup %1750  ;;  %v907_v62 = vsel %vm904_vm7, %v906_v52, %v902_v49  ;;  %vm2541_vm14 = vmor %vm959_vm12, %vm960_vm9  ;;  %v846_v20 = vor.u32 1.1754944e-38, %v845_v2  ;;  %v778_v40 = vadd.f32 %v2468_v28, %v777_v10  ;;  %vm1114_vm4 = vcmp.eq.s32.totalorder %v2478_v34, 1 }
 0x1c5   : > { %v956_v42 = vsub.f32 1.0, %v955_v33  ;;  %v835_v43 = vmul.f32 %v2482_v37, %v2459_v22  ;;  %1754 = vrcp.f32 %v2480_v35  ;;  %v2489_v44 = vpop.eup %1752  ;;  %vm840_vm10 = vweird.f32 %v2482_v37  ;;  %v1042_v33 = vld [vmem:[%s2341_s8 + $0x60] sm:$0xff]  ;;  %vm2575_vm9 = vmor %vm914_vm5, %vm915_vm6 }
 0x1c6   : > { %v2513_v55 = vmul.f32 %v2489_v44, %v2442_v9  ;;  %1756 = vrcp.f32 %v2473_v31  ;;  %v908_v12 = vmul.f32 %v907_v62, %v670_v61  ;;  %vm841_vm0 = vmor %vm839_vm13, %vm840_vm10  ;;  %vm779_vm10 = vweird.f32 %v2447_v15  ;;  %v667_v62 = vld [vmem:[#allocation2 + $0x68] sm:$0xff] }
 0x1c7   : > { %v957_v47 = vmul.f32 %v2470_v29, %v956_v42  ;;  %v836_v48 = vsub.f32 1.0, %v835_v43  ;;  %v860_v42 = vand.u32 2147483648, %v2480_v35  ;;  %v783_v49 = vand.u32 2147483647, %v2447_v15  ;;  %vm2585_vm12 = vmor %vm779_vm10, %vm780_vm3 }
 0x1c8   : > { %vm854_vm5 = vweird.f32 %v2480_v35  ;;  %v978_v58 = vand.u32 2147483647, %v2440_v4  ;;  %v782_v1 = vsel %vm2585_vm12, %v2468_v28, %v778_v40  ;;  %v786_v2 = vor.u32 1.1754944e-38, %v785_v57  ;;  %v1035_v57 = vld [vmem:[%s2341_s8 + $0x28] sm:$0xff] }
 0x1c9   : > { %v837_v59 = vmul.f32 %v2482_v37, %v836_v48  ;;  %v958_v5 = vadd.f32 %v2470_v29, %v957_v47  ;;  %v861_v61 = vor.u32 1.1754944e-38, %v860_v42  ;;  %v981_v28 = vor.u32 1.1754944e-38, %v980_v51 }
 0x1ca   : > { %v917_v4 = vsel %vm2575_vm9, %v2450_v16, %v2504_v53  ;;  %vm930_vm3 = vweird.f32 %v2489_v44  ;;  %vm794_vm10 = vweird.f32 %v2473_v31  ;;  %v800_v13 = vand.u32 2147483648, %v2473_v31 }
 0x1cb   : > { %v2519_v60 = vpop.permute.xlu0 %766  ;;  %v2521_v63 = vpop.eup %1754  ;;  %v838_v21 = vadd.f32 %v2482_v37, %v837_v59  ;;  %v962_v26 = vsel %vm2541_vm14, %v2470_v29, %v958_v5  ;;  %v858_v29 = vand.u32 2147483647, %v2480_v35  ;;  %v926_v59 = vsub.f32 1.0, %v2513_v55 }
 0x1cc   : > { %v1088_v3 = vpop.permute.xlu1 %1087  ;;  %v850_v7 = vmul.f32 %v2521_v63, %v2480_v35  ;;  %v2537_v11 = vpop.permute.xlu2 %711  ;;  %v967_v32 = vsel %vm964_vm1, %v966_v17, %v962_v26  ;;  %vm855_vm7 = vweird.f32 %v2521_v63  ;;  %1758 = vrcp.f32 %v2519_v60 }
 0x1cd   : > { %vm1118_vm15 = vcmp.eq.s32.totalorder %v1088_v3, 1  ;;  %v842_v30 = vsel %vm841_vm0, %v2482_v37, %v838_v21  ;;  %v968_v39 = vmul.f32 %v967_v32, %v674_v23  ;;  %v2557_v41 = vpop.eup %1756  ;;  %vm856_vm6 = vmor %vm854_vm5, %vm855_vm7  ;;  %vm859_vm13 = vcmp.eq.f32.partialorder %v858_v29, 8.507059e+37  ;;  %v675_v32 = vld [vmem:[#allocation2 + $0x70] sm:$0xff] }
 0x1ce   : > { %v851_v18 = vsub.f32 1.0, %v850_v7  ;;  %v1134_v22 = vsel %vm1118_vm15, %v908_v12, %v1038_v8  ;;  %v847_v36 = vsel %vm844_vm2, %v846_v20, %v842_v30  ;;  %v790_v56 = vmul.f32 %v2557_v41, %v2473_v31  ;;  %v662_v8 = vld [vmem:[#allocation2 + $0x30] sm:$0xff] }
 0x1cf   : > { %1202 = vmatmul.f32.vlgmr.msra.gmra.mxu2 %v1134_v22  ;;  %v848_v43 = vmul.f32 %v847_v36, %v666_v25  ;;  %v1138_v45 = vsel %vm1122_vm8, %v968_v39, %v1042_v33  ;;  %vm975_vm8 = vweird.f32 %v2462_v24  ;;  %v973_v5 = vadd.f32 %v2462_v24, %v2509_v54 }
 0x1d0   : > { %v852_v27 = vmul.f32 %v2521_v63, %v851_v18  ;;  %1214 = vmatmul.f32.vlgmr.msra.gmra.mxu3 %v1138_v45  ;;  %vm2609_vm14 = vmor %vm974_vm11, %vm975_vm8  ;;  %vm784_vm15 = vcmp.eq.f32.partialorder %v783_v49, 8.507059e+37  ;;  %vm2618_vm0 = vcmp.eq.f32.partialorder %v918_v46, 8.507059e+37  ;;  %v791_v6 = vsub.f32 1.0, %v790_v56  ;;  %v1030_v18 = vld [vmem:[%s2341_s8] sm:$0xff]  ;;  %v1039_v45 = vld [vmem:[%s2341_s8 + $0x48] sm:$0xff] }
 0x1d1   : > { %v1130_v52 = vsel %vm1114_vm4, %v848_v43, %v1034_v38  ;;  %v787_v10 = vsel %vm784_vm15, %v786_v2, %v782_v1  ;;  %v927_v0 = vmul.f32 %v2489_v44, %v926_v59  ;;  %vm929_vm11 = vweird.f32 %v2442_v9 }
 0x1d2   : > { %v853_v48 = vadd.f32 %v2521_v63, %v852_v27  ;;  %1190 = vmatmul.f32.vlgmr.msra.gmra.mxu1 %v1130_v52  ;;  %v2622_v54 = vpop.eup %1758  ;;  %vm2634_vm2 = vcmp.eq.f32.partialorder %v978_v58, 8.507059e+37  ;;  %v977_v21 = vsel %vm2609_vm14, %v2462_v24, %v973_v5  ;;  %v935_v23 = vand.u32 2147483648, %v2442_v9  ;;  %v671_v27 = vld [vmem:[#allocation2 + $0x20] sm:$0xff]  ;;  %vm2669_vm7 = vmor %vm929_vm11, %vm930_vm3 }
 0x1d3   : > { %v2562_v37 = vpop.permute.xlu0 %706  ;;  %v788_v20 = vmul.f32 %v787_v10, %v662_v8  ;;  %v922_v22 = vsel %vm2618_vm0, %v2500_v50, %v917_v4  ;;  %v792_v25 = vmul.f32 %v2557_v41, %v791_v6  ;;  %v985_v26 = vmul.f32 %v2622_v54, %v2519_v60  ;;  %v663_v4 = vld [vmem:[#allocation2] sm:$0xff] }
 0x1d4   : > { %v2568_v47 = vpop.permute.xlu1 %726  ;;  %1760 = vrcp.f32 %v2562_v37  ;;  %v1079_v3 = vpop.permute.xlu2 %1078  ;;  %v857_v35 = vsel %vm856_vm6, %v2521_v63, %v853_v48  ;;  %v982_v33 = vsel %vm2634_vm2, %v981_v28, %v977_v21  ;;  %v928_v50 = vadd.f32 %v2489_v44, %v927_v0 }
 0x1d5   : > { %1762 = vrcp.f32 %v2452_v19  ;;  %v862_v15 = vsel %vm859_vm13, %v861_v61, %v857_v35  ;;  %vm1115_vm1 = vcmp.eq.s32.totalorder %v1079_v3, 1  ;;  %v933_v38 = vand.u32 2147483647, %v2442_v9  ;;  %v1043_v9 = vld [vmem:[%s2341_s8 + $0x68] sm:$0xff] }
 0x1d6   : > { %v863_v7 = vmul.f32 %v862_v15, %v667_v62  ;;  %1764 = vrcp.f32 %v2568_v47  ;;  %v936_v39 = vor.u32 1.1754944e-38, %v935_v23  ;;  %v923_v40 = vmul.f32 %v922_v22, %v671_v27  ;;  %v1031_v23 = vld [vmem:[%s2341_s8 + $0x8] sm:$0xff] }
 0x1d7   : > { %vm795_vm9 = vweird.f32 %v2557_v41  ;;  %v986_v43 = vsub.f32 1.0, %v985_v26  ;;  %v983_v48 = vmul.f32 %v982_v33, %v675_v32  ;;  %v793_v34 = vadd.f32 %v2557_v41, %v792_v25  ;;  %v672_v26 = vld [vmem:[#allocation2 + $0x10] sm:$0xff] }
 0x1d8   : > { %v1131_v16 = vsel %vm1115_vm1, %v863_v7, %v1035_v57  ;;  %v932_v58 = vsel %vm2669_vm7, %v2489_v44, %v928_v50  ;;  %v798_v59 = vand.u32 2147483647, %v2473_v31  ;;  %vm2690_vm12 = vmor %vm794_vm10, %vm795_vm9  ;;  %vm934_vm6 = vcmp.eq.f32.partialorder %v933_v38, 8.507059e+37 }
 0x1d9   : > { %vm944_vm13 = vweird.f32 %v2452_v19  ;;  %v948_v35 = vand.u32 2147483647, %v2452_v19  ;;  %v987_v5 = vmul.f32 %v2622_v54, %v986_v43  ;;  %v797_v28 = vsel %vm2690_vm12, %v2557_v41, %v793_v34 }
 0x1da   : > { %v2628_v51 = vpop.eup %1760  ;;  %1193 = vmatmul.f32.gmra.mxu1 %v1131_v16  ;;  %v801_v57 = vor.u32 1.1754944e-38, %v800_v13  ;;  %v937_v63 = vsel %vm934_vm6, %v936_v39, %v932_v58  ;;  %vm799_vm0 = vcmp.eq.f32.partialorder %v798_v59, 8.507059e+37  ;;  %v815_v10 = vand.u32 2147483648, %v2562_v37  ;;  %v664_v39 = vld [vmem:[#allocation2 + $0x58] sm:$0xff] }
 0x1db   : > { %v2632_v46 = vpop.permute.xlu0 %771  ;;  %v2638_v14 = vpop.eup %1762  ;;  %v805_v17 = vmul.f32 %v2628_v51, %v2562_v37  ;;  %vm810_vm15 = vweird.f32 %v2628_v51  ;;  %vm990_vm11 = vweird.f32 %v2622_v54  ;;  %vm809_vm1 = vweird.f32 %v2562_v37 }
 0x1dc   : > { %v1064_v53 = vpop.permute.xlu1 %1063  ;;  %1766 = vrcp.f32 %v2632_v46  ;;  %v940_v24 = vmul.f32 %v2638_v14, %v2452_v19  ;;  %v2663_v29 = vpop.eup %1764  ;;  %vm945_vm14 = vweird.f32 %v2638_v14  ;;  %v802_v0 = vsel %vm799_vm0, %v801_v57, %v797_v28  ;;  %vm2720_vm3 = vmor %vm809_vm1, %vm810_vm15 }
 0x1dd   : > { %vm1110_vm4 = vcmp.eq.s32.totalorder %v1064_v53, 1  ;;  %1768 = vrcp.f32 %v2537_v11  ;;  %v806_v36 = vsub.f32 1.0, %v805_v17  ;;  %v865_v3 = vmul.f32 %v2663_v29, %v2568_v47  ;;  %vm2750_vm10 = vmor %vm944_vm13, %vm945_vm14  ;;  %v1070_v43 = vpop.permute.xlu2 %1069 }
 0x1de   : > { %v1126_v30 = vsel %vm1110_vm4, %v788_v20, %v1030_v18  ;;  %v941_v52 = vsub.f32 1.0, %v940_v24  ;;  %v813_v12 = vand.u32 2147483647, %v2562_v37  ;;  %v988_v17 = vadd.f32 %v2622_v54, %v987_v5  ;;  %v1044_v5 = vld [vmem:[%s2341_s8 + $0x70] sm:$0xff] }
 0x1df   : > { %1178 = vmatmul.f32.vlgmr.msra.gmra.mxu0 %v1126_v30  ;;  %v807_v61 = vmul.f32 %v2628_v51, %v806_v36  ;;  %v866_v41 = vsub.f32 1.0, %v865_v3  ;;  %vm989_vm2 = vweird.f32 %v2519_v60  ;;  %v993_v16 = vand.u32 2147483647, %v2519_v60 }
 0x1e0   : > { %v942_v15 = vmul.f32 %v2638_v14, %v941_v52  ;;  %v995_v53 = vand.u32 2147483648, %v2519_v60  ;;  %v803_v25 = vmul.f32 %v802_v0, %v663_v4  ;;  %vm2737_vm4 = vmor %vm989_vm2, %vm990_vm11  ;;  %v816_v30 = vor.u32 1.1754944e-38, %v815_v10  ;;  %v676_v52 = vld [vmem:[#allocation2 + $0x78] sm:$0xff] }
 0x1e1   : > { %v808_v7 = vadd.f32 %v2628_v51, %v807_v61  ;;  %v867_v32 = vmul.f32 %v2663_v29, %v866_v41  ;;  %v950_v33 = vand.u32 2147483648, %v2452_v19  ;;  %vm814_vm9 = vcmp.eq.f32.partialorder %v813_v12, 8.507059e+37  ;;  %v1040_v61 = vld [vmem:[%s2341_s8 + $0x50] sm:$0xff]  ;;  %v668_v12 = vld [vmem:[#allocation2 + $0x8] sm:$0xff] }
 0x1e2   : > { %v2676_v49 = vpop.eup %1766  ;;  %v2728_v20 = vadd.f32 %v2638_v14, %v942_v15  ;;  %v996_v38 = vor.u32 1.1754944e-38, %v995_v53  ;;  %v938_v42 = vmul.f32 %v937_v63, %v672_v26  ;;  %v875_v58 = vand.u32 2147483648, %v2568_v47  ;;  %v1041_v26 = vld [vmem:[%s2341_s8 + $0x58] sm:$0xff] }
 0x1e3   : > { %v1091_v56 = vpop.permute.xlu0 %1090  ;;  %v1000_v62 = vmul.f32 %v2676_v49, %v2632_v46  ;;  %v2696_v31 = vpop.eup %1768  ;;  %v812_v60 = vsel %vm2720_vm3, %v2628_v51, %v808_v7  ;;  %v992_v51 = vsel %vm2737_vm4, %v2622_v54, %v988_v17  ;;  %vm1005_vm12 = vweird.f32 %v2676_v49 }
 0x1e4   : > { %vm1119_vm8 = vcmp.eq.s32.totalorder %v1091_v56, 1  ;;  %v1103_v1 = vpop.permute.xlu1 %1102  ;;  %v820_v8 = vmul.f32 %v2696_v31, %v2537_v11  ;;  %v1010_v54 = vand.u32 2147483648, %v2632_v46  ;;  %v868_v56 = vadd.f32 %v2663_v29, %v867_v32 }
 0x1e5   : > { %vm1123_vm5 = vcmp.eq.s32.totalorder %v1103_v1, 1  ;;  %v1135_v44 = vsel %vm1119_vm8, %v923_v40, %v1039_v45  ;;  %v1001_v6 = vsub.f32 1.0, %v1000_v62  ;;  %v817_v40 = vsel %vm814_vm9, %v816_v30, %v812_v60 }
 0x1e6   : > { %1205 = vmatmul.f32.gmra.mxu2 %v1135_v44  ;;  %v1139_v55 = vsel %vm1123_vm5, %v983_v48, %v1043_v9  ;;  %v821_v27 = vsub.f32 1.0, %v820_v8  ;;  %vm994_vm8 = vcmp.eq.f32.partialorder %v993_v16, 8.507059e+37  ;;  %v947_v45 = vsel %vm2750_vm10, %v2638_v14, %v2728_v20  ;;  %v1032_v44 = vld [vmem:[%s2341_s8 + $0x10] sm:$0xff] }
 0x1e7   : > { %1217 = vmatmul.f32.gmra.mxu3 %v1139_v55  ;;  %v1002_v37 = vmul.f32 %v2676_v49, %v1001_v6  ;;  %vm870_vm5 = vweird.f32 %v2663_v29  ;;  %v997_v13 = vsel %vm994_vm8, %v996_v38, %v992_v51  ;;  %vm1004_vm6 = vweird.f32 %v2632_v46  ;;  %v1036_v20 = vld [vmem:[%s2341_s8 + $0x30] sm:$0xff] }
 0x1e8   : > { %v822_v34 = vmul.f32 %v2696_v31, %v821_v27  ;;  %v1008_v14 = vand.u32 2147483647, %v2632_v46  ;;  %v818_v59 = vmul.f32 %v817_v40, %v664_v39  ;;  %vm869_vm13 = vweird.f32 %v2568_v47  ;;  %vm2774_vm15 = vmor %vm1004_vm6, %vm1005_vm12  ;;  %v1045_v27 = vld [vmem:[%s2341_s8 + $0x78] sm:$0xff] }
 0x1e9   : > { %v1003_v48 = vadd.f32 %v2676_v49, %v1002_v37  ;;  %v873_v62 = vand.u32 2147483647, %v2568_v47  ;;  %vm1112_vm14 = vcmp.eq.s32.totalorder %v1070_v43, 1  ;;  %vm2784_vm0 = vmor %vm869_vm13, %vm870_vm5  ;;  %v1011_v47 = vor.u32 1.1754944e-38, %v1010_v54  ;;  %v669_v54 = vld [vmem:[#allocation2 + $0x48] sm:$0xff] }
 0x1ea   : > { %v998_v28 = vmul.f32 %v997_v13, %v676_v52  ;;  %v872_v6 = vsel %vm2784_vm0, %v2663_v29, %v868_v56  ;;  %v876_v7 = vor.u32 1.1754944e-38, %v875_v58  ;;  %v1128_v8 = vsel %vm1112_vm14, %v818_v59, %v1032_v44  ;;  %v673_v29 = vld [vmem:[#allocation2 + $0x38] sm:$0xff] }
 0x1eb   : > { %v2724_v21 = vpop.permute.xlu0 %731  ;;  %v1007_v15 = vsel %vm2774_vm15, %v2676_v49, %v1003_v48  ;;  %vm1009_vm2 = vcmp.eq.f32.partialorder %v1008_v14, 8.507059e+37  ;;  %v951_v41 = vor.u32 1.1754944e-38, %v950_v33  ;;  %vm874_vm3 = vcmp.eq.f32.partialorder %v873_v62, 8.507059e+37  ;;  %v677_v49 = vld [vmem:[#allocation2 + $0x28] sm:$0xff]  ;;  %v1033_v48 = vld [vmem:[%s2341_s8 + $0x18] sm:$0xff] }
 0x1ec   : > { %1770 = vrcp.f32 %v2724_v21  ;;  %v1067_v22 = vpop.permute.xlu1 %1066  ;;  %v1012_v0 = vsel %vm1009_vm2, %v1011_v47, %v1007_v15  ;;  %v877_v17 = vsel %vm874_vm3, %v876_v7, %v872_v6  ;;  %vm949_vm4 = vcmp.eq.f32.partialorder %v948_v35, 8.507059e+37  ;;  %v1037_v52 = vld [vmem:[%s2341_s8 + $0x38] sm:$0xff]  ;;  %v1739_v14 = vld [vmem:[%s2992_s1] ss:$0 sm:$0xff] }
 0x1ed   : > { %vm1111_vm7 = vcmp.eq.s32.totalorder %v1067_v22, 1  ;;  %v952_v16 = vsel %vm949_vm4, %v951_v41, %v947_v45  ;;  %v823_v53 = vadd.f32 %v2696_v31, %v822_v34  ;;  %v830_v18 = vand.u32 2147483648, %v2537_v11 }
 0x1ee   : > { %v1127_v50 = vsel %vm1111_vm7, %v803_v25, %v1031_v23  ;;  %vm825_vm7 = vweird.f32 %v2696_v31  ;;  %v1109_v23 = vpop.permute.xlu2 %1108  ;;  %v1013_v37 = vmul.f32 %v1012_v0, %v677_v49  ;;  %vm824_vm10 = vweird.f32 %v2537_v11 }
 0x1ef   : > { %1181 = vmatmul.f32.gmra.mxu0 %v1127_v50  ;;  %v828_v19 = vand.u32 2147483647, %v2537_v11  ;;  %v890_v35 = vand.u32 2147483648, %v2724_v21  ;;  %v878_v60 = vmul.f32 %v877_v17, %v668_v12  ;;  %vm2811_vm8 = vmor %vm824_vm10, %vm825_vm7  ;;  %vm884_vm12 = vweird.f32 %v2724_v21 }
 0x1f0   : > { %v888_v30 = vand.u32 2147483647, %v2724_v21  ;;  %v953_v33 = vmul.f32 %v952_v16, %v673_v29  ;;  %vm1125_vm6 = vcmp.eq.s32.totalorder %v1109_v23, 1  ;;  %v827_v51 = vsel %vm2811_vm8, %v2696_v31, %v823_v53 }
 0x1f1   : > { %v831_v36 = vor.u32 1.1754944e-38, %v830_v18  ;;  %v1141_v38 = vsel %vm1125_vm6, %v1013_v37, %v1045_v27  ;;  %v891_v40 = vor.u32 1.1754944e-38, %v890_v35  ;;  %vm829_vm15 = vcmp.eq.f32.partialorder %v828_v19, 8.507059e+37 }
 0x1f2   : > { %v2764_v9 = vpop.eup %1770  ;;  %vm889_vm0 = vcmp.eq.f32.partialorder %v888_v30, 8.507059e+37 }
 0x1f3   : > { %v880_v2 = vmul.f32 %v2764_v9, %v2724_v21  ;;  %v1094_v3 = vpop.permute.xlu0 %1093  ;;  %vm885_vm9 = vweird.f32 %v2764_v9  ;;  %v832_v43 = vsel %vm829_vm15, %v831_v36, %v827_v51 }
 0x1f4   : > { %vm1120_vm11 = vcmp.eq.s32.totalorder %v1094_v3, 1  ;;  %v1106_v55 = vpop.permute.xlu1 %1105  ;;  %vm2819_vm13 = vmor %vm884_vm12, %vm885_vm9 }
 0x1f5   : > { %v881_v57 = vsub.f32 1.0, %v880_v2  ;;  %vm1124_vm1 = vcmp.eq.s32.totalorder %v1106_v55, 1  ;;  %v1136_v63 = vsel %vm1120_vm11, %v938_v42, %v1040_v61  ;;  %v665_v42 = vld [vmem:[#allocation2 + $0x18] sm:$0xff] }
 0x1f6   : > { %1208 = vmatmul.f32.gmra.mxu2 %v1136_v63  ;;  %v1140_v10 = vsel %vm1124_vm1, %v998_v28, %v1044_v5  ;;  %v833_v34 = vmul.f32 %v832_v43, %v665_v42 }
 0x1f7   : > { %v882_v4 = vmul.f32 %v2764_v9, %v881_v57  ;;  %1184 = vmatmul.f32.gmra.mxu0 %v1128_v8  ;;  %1220 = vmatmul.f32.gmra.mxu3 %v1140_v10 }
 0x1f9   : > { %v883_v22 = vadd.f32 %v2764_v9, %v882_v4 }
 0x1fb   : > { %v1082_v25 = vpop.permute.xlu0 %1081  ;;  %v887_v39 = vsel %vm2819_vm13, %v2764_v9, %v883_v22 }
 0x1fc   : > { %vm1116_vm5 = vcmp.eq.s32.totalorder %v1082_v25, 1  ;;  %v1097_v32 = vpop.permute.xlu1 %1096  ;;  %v892_v45 = vsel %vm889_vm0, %v891_v40, %v887_v39 }
 0x1fd   : > { %vm1121_vm14 = vcmp.eq.s32.totalorder %v1097_v32, 1  ;;  %v1132_v50 = vsel %vm1116_vm5, %v878_v60, %v1036_v20  ;;  %v893_v56 = vmul.f32 %v892_v45, %v669_v54 }
 0x1fe   : > { %1196 = vmatmul.f32.gmra.mxu1 %v1132_v50  ;;  %v1137_v21 = vsel %vm1121_vm14, %v953_v33, %v1041_v26 }
 0x1ff   : > { %1211 = vmatmul.f32.gmra.mxu2 %v1137_v21  ;;  %1223 = vmatmul.f32.gmra.mxu3 %v1141_v38 }
 0x203   : > { %v1073_v31 = vpop.permute.xlu0 %1072 }
 0x204   : > { %vm1113_vm11 = vcmp.eq.s32.totalorder %v1073_v31, 1  ;;  %v1085_v13 = vpop.permute.xlu1 %1084 }
 0x205   : > { %vm1117_vm1 = vcmp.eq.s32.totalorder %v1085_v13, 1  ;;  %v1129_v9 = vsel %vm1113_vm11, %v833_v34, %v1033_v48 }
 0x206   : > { %1187 = vmatmul.f32.gmra.mxu0 %v1129_v9  ;;  %v1133_v58 = vsel %vm1117_vm1, %v893_v56, %v1037_v52 }
 0x207   : > { %1199 = vmatmul.f32.gmra.mxu1 %v1133_v58 }
 0x24f   : > { %v1191_v59 = vpop.f32.mrf.mxu1 }
 0x250   : > { %v1192_v61 = vadd.f32 %v1739_v14, %v1191_v59 }
 0x252   : > { %v1203_v62 = vpop.f32.mrf.mxu2  ;;  %v1231_v2 = vmax.f32 %v1192_v61, 0.0 }
 0x253   : > { %v1204_v1 = vadd.f32 %v1739_v14, %v1203_v62  ;;  %v1215_v44 = vpop.f32.mrf.mxu3 }
 0x254   : > { %1247 = vst [vmem:[%s2351_s28 + $0x20] sm:$0xff] %v1231_v2  ;;  %v1216_v5 = vadd.f32 %v1739_v14, %v1215_v44 }
 0x255   : > { %v1235_v3 = vmax.f32 %v1204_v1, 0.0 }
 0x256   : > { %v1239_v46 = vmax.f32 %v1216_v5, 0.0 }
 0x257   : > { %1251 = vst [vmem:[%s2351_s28 + $0x40] sm:$0xff] %v1235_v3  ;;  %v1194_v47 = vpop.f32.mrf.mxu1 }
 0x258   : > { %v1195_v55 = vadd.f32 %v1739_v14, %v1194_v47  ;;  %1255 = vst [vmem:[%s2351_s28 + $0x60] sm:$0xff] %v1239_v46 }
 0x25a   : > { %v1232_v15 = vmax.f32 %v1195_v55, 0.0 }
 0x25c   : > { %v1179_v28 = vpop.f32.mrf.mxu0  ;;  %1248 = vst [vmem:[%s2351_s28 + $0x28] sm:$0xff] %v1232_v15 }
 0x25d   : > { %v1180_v57 = vadd.f32 %v1739_v14, %v1179_v28 }
 0x25f   : > { %v1227_v63 = vmax.f32 %v1180_v57, 0.0 }
 0x261   : > { %1243 = vst [vmem:[%s2351_s28] sm:$0xff] %v1227_v63 }
 0x269   : > { %v1206_v6 = vpop.f32.mrf.mxu2 }
 0x26a   : > { %v1207_v7 = vadd.f32 %v1739_v14, %v1206_v6  ;;  %v1218_v8 = vpop.f32.mrf.mxu3 }
 0x26b   : > { %v1219_v10 = vadd.f32 %v1739_v14, %v1218_v8 }
 0x26c   : > { %v1236_v41 = vmax.f32 %v1207_v7, 0.0  ;;  %v1182_v4 = vpop.f32.mrf.mxu0 }
 0x26d   : > { %v1240_v49 = vmax.f32 %v1219_v10, 0.0  ;;  %v1183_v0 = vadd.f32 %v1739_v14, %v1182_v4 }
 0x26e   : > { %1252 = vst [vmem:[%s2351_s28 + $0x48] sm:$0xff] %v1236_v41 }
 0x26f   : > { %1256 = vst [vmem:[%s2351_s28 + $0x68] sm:$0xff] %v1240_v49  ;;  %v1228_v12 = vmax.f32 %v1183_v0, 0.0 }
 0x271   : > { %1244 = vst [vmem:[%s2351_s28 + $0x8] sm:$0xff] %v1228_v12 }
 0x274   : > { %v1185_v17 = vpop.f32.mrf.mxu0 }
 0x275   : > { %v1186_v29 = vadd.f32 %v1739_v14, %v1185_v17 }
 0x277   : > { %v1229_v16 = vmax.f32 %v1186_v29, 0.0 }
 0x279   : > { %1245 = vst [vmem:[%s2351_s28 + $0x10] sm:$0xff] %v1229_v16  ;;  %v1209_v53 = vpop.f32.mrf.mxu2 }
 0x27a   : > { %v1210_v18 = vadd.f32 %v1739_v14, %v1209_v53  ;;  %v1221_v23 = vpop.f32.mrf.mxu3 }
 0x27b   : > { %v1222_v20 = vadd.f32 %v1739_v14, %v1221_v23  ;;  %v1197_v37 = vpop.f32.mrf.mxu1 }
 0x27c   : > { %v1237_v22 = vmax.f32 %v1210_v18, 0.0  ;;  %v1198_v19 = vadd.f32 %v1739_v14, %v1197_v37 }
 0x27d   : > { %v1241_v35 = vmax.f32 %v1222_v20, 0.0 }
 0x27e   : > { %1253 = vst [vmem:[%s2351_s28 + $0x50] sm:$0xff] %v1237_v22  ;;  %v1233_v25 = vmax.f32 %v1198_v19, 0.0 }
 0x27f   : > { %1257 = vst [vmem:[%s2351_s28 + $0x70] sm:$0xff] %v1241_v35 }
 0x280   : > { %1249 = vst [vmem:[%s2351_s28 + $0x30] sm:$0xff] %v1233_v25 }
 0x282   : > { %v1212_v60 = vpop.f32.mrf.mxu2  ;;  %v1224_v26 = vpop.f32.mrf.mxu3 }
 0x283   : > { %v1213_v27 = vadd.f32 %v1739_v14, %v1212_v60  ;;  %v1225_v24 = vadd.f32 %v1739_v14, %v1224_v26  ;;  %v1188_v30 = vpop.f32.mrf.mxu0 }
 0x284   : > { %v1189_v32 = vadd.f32 %v1739_v14, %v1188_v30  ;;  %v1200_v33 = vpop.f32.mrf.mxu1 }
 0x285   : > { %v1238_v11 = vmax.f32 %v1213_v27, 0.0  ;;  %v1242_v50 = vmax.f32 %v1225_v24, 0.0  ;;  %v1201_v51 = vadd.f32 %v1739_v14, %v1200_v33 }
 0x286   : > { %v1230_v36 = vmax.f32 %v1189_v32, 0.0 }
 0x287   : > { %1254 = vst [vmem:[%s2351_s28 + $0x58] sm:$0xff] %v1238_v11  ;;  %v1234_v21 = vmax.f32 %v1201_v51, 0.0 }
 0x288   : > { %1258 = vst [vmem:[%s2351_s28 + $0x78] sm:$0xff] %v1242_v50 }
 0x289   : > { %1246 = vst [vmem:[%s2351_s28 + $0x18] sm:$0xff] %v1230_v36 }
 0x28a   : > { %1250 = vst [vmem:[%s2351_s28 + $0x38] sm:$0xff] %v1234_v21 }
 0x28b PF: > { %s2993_s11 = sld [smem:[#allocation19_spill]]  ;;  %s1272_s17 = sshll.u32 %s2351_s28, 4  ;;  %s1273_s17 = int_to_ptr.vmem [resolvable:$true] %s1272_s17 }
 0x28c   : > { %s2994_s24 = sld [smem:[#allocation29_spill]]  ;;  %s1260_s4 = scalar_lea.sflag [#allocation6], %s314_s23 }
 0x291   : > { %s1445_s9 = sshll.u32 %s2993_s11, 7 }
 0x292   : > { %s2995_s7 = smov %s2994_s24  ;;  %s1271_s13 = scalar_lea.hbm %s2994_s24, %s1445_s9 }
 0x293   : > { %s1274_s0 = sshll.u32 %s1271_s13, 4  ;;  %s1912_s27 = scalar_lea.hbm %s2995_s7, 256  ;;  %s1275_s0 = int_to_ptr.hbm [resolvable:$true] %s1274_s0 }
 0x294   : > { %s1906_s12 = sshra.s32 %s1275_s0, 4  ;;  %s1907_s12 = int_to_ptr.hbm [resolvable:$true] %s1906_s12 }
 0x295   : > { %s1908_s10 = scalar_lea.hbm %s1907_s12, 128  ;;  %p1913_p0 = scmp.lt.s32.totalorder %s1907_s12, %s2995_s7 }
 0x296   : > { %p1909_p13 = scmp.ne.s32.totalorder %s1907_s12, %s1908_s10  ;;  %p1914_p4 = scmp.lt.s32.totalorder %s1912_s27, %s1908_s10 }
 0x298   : > { %p1910_p2 = pnand %p1909_p13, %p2294_p10  ;;  %p1915_p5 = por %p1914_p4, %p1913_p0 }
 0x29a   : > { %p1911_p3 = pneg %p1910_p2 }
 0x29c   : > { %p1916_p6 = pnand %p1915_p5, %p1911_p3 }
 0x29e   : > { %1919 = shalt.err (!%p1916_p6)
}
 0x29f   : > { %s2059_s23 = smov 128   ;;  %s2060_s28 = smov 8  }
 0x2a0   : > { %1591 = dma.vmem_to_hbm [thread:$0]  (%p2294_p10), %s1273_s17, 2048, %s1275_s0, %s1260_s4, %s2059_s23, %s2059_s23, %s2060_s28  }
 0x2a1 PF: > { %p1614_p11 = scmp.ge.s32.totalorder %s2050_s6, 2  ;;  %s1289_s11 = sand.u32 1, %s1998_s18  }
 0x2a2   : > { %s1290_s9 = scalar_lea.sflag [#allocation6], %s1289_s11 }
 0x2a3   : > { %p1608_p8 = pnand %p1614_p11, %p2305_p7 }
 0x2a5   : > { %p1609_p1 = pneg %p1608_p8 }
 0x2a7   : > { %1993 = dma.done.wait (%p1609_p1), %s1290_s9, 2048  }
 0x2a8   : > { %1995 = vsyncadd (%p1609_p1), %s1290_s9, 4294965248  ;;  %s25_s6 = sadd.s32 1, %s2050_s6   ;;  %s2997_s14 = sld [smem:[#allocation18_spill]] }
 0x2a9   : > { %p2872_p9 = scmp.ge.s32.totalorder %s25_s6, 6   ;;  %s2998_s23 = sld [smem:[#allocation23_spill]] }
 0x2aa   : > { %s2999_s29 = sld [smem:[#allocation24_spill]]  ;;  %s3003_s18 = smov %s2002_s19 }
 0x2ab   : > { %s3000_s27 = sld [smem:[#allocation20_spill]]  ;;  %s3004_s19 = smov %s2006_s20 }
 0x2ac   : > { %s3001_s3 = sld [smem:[#allocation21_spill]]  ;;  %s3005_s20 = smov %s2282_s15 }
 0x2ad   : > { %s3002_s13 = sld [smem:[#allocation22_spill]]  ;;  %s3006_s21 = smov %s2014_s22 }
 0x2ae   : > { %s3007_s22 = smov %s2997_s14  ;;  %s3008_s24 = smov %s2026_s25 }
 0x2af   : > { %s3009_s25 = smov %s2030_s26  ;;  %s3011_s28 = smov %s2046_s30 }
 0x2b0   : > { %s3010_s26 = smov %s2999_s29  ;;  %24 = sbr.rel (!%p2872_p9) target bundleno = 19 (0x13), region = 121 }
 0x2b2   : > { %s3012_s29 = smov %s3001_s3 }
 0x2b3   : > { %s3013_s30 = smov %s3002_s13 }
 0x2b5   :  { %1296 = vsyncpa [#allocation5], 1 }
 0x2b6   :  { %1298 = vsyncpa [#allocation5 + $0x1], 1 }
 0x2b7   :  { %1299 = vsyncpa [#allocation8], 1 }
 0x2b8   :  { %1301 = vsyncpa [#allocation8 + $0x1], 1 }
 0x2b9   :  { %1302 = vsyncpa [#allocation11], 1 }
 0x2ba   :  { %1303 = vsyncpa [#allocation6], 1 }
 0x2bb   :  { %1305 = vsyncpa [#allocation6 + $0x1], 1 }

</bundles_post_ra>
